<compile_context>
chip_gen: v7x
topology: tpu7x:2x2x1
jax: 0.10.0
libtpu: 0.0.40
codegen_flags: <defaults>
</compile_context>

<pallas_src>
import functools

import jax
import jax.numpy as jnp
import numpy as np
from jax import lax
from jax.experimental import pallas as pl
from jax.experimental.pallas import tpu as pltpu


def _round_up(x, m):
    return (x + m - 1) // m * m


def _pad_axis(a, axis, size):
    if a.shape[axis] == size:
        return a
    pad = [(0, 0)] * a.ndim
    pad[axis] = (0, size - a.shape[axis])
    return jnp.pad(a, pad)


def _pick_tm(m):
    """Largest row tile that divides M exactly and leaves >= 2 grid steps."""
    for tm in (512, 256, 128, 64, 32, 16, 8):
        if m % tm == 0 and m // tm >= 2:
            return tm
    return m  # single block; block_shape == full array dim is always legal


# ----------------------------------------------------------------------------
# Pallas kernels (fused matmul epilogues, lane-dense N, default MXU precision)
# ----------------------------------------------------------------------------
def _mm_bias_relu_kernel(x_ref, w_ref, b_ref, o_ref):
    y = jnp.dot(x_ref[...], w_ref[...], preferred_element_type=jnp.float32)
    o_ref[...] = jnp.maximum(y + b_ref[...], 0.0).astype(o_ref.dtype)


def _mm_bias_add_relu_kernel(x_ref, w_ref, b_ref, s_ref, ws_ref, bs_ref, o_ref):
    y = jnp.dot(x_ref[...], w_ref[...], preferred_element_type=jnp.float32)
    y = y + b_ref[...]
    y = y + jnp.dot(s_ref[...], ws_ref[...], preferred_element_type=jnp.float32)
    y = y + bs_ref[...]
    o_ref[...] = jnp.maximum(y, 0.0).astype(o_ref.dtype)


def _conv_mm_relu(patches, w, b):
    m, k = patches.shape
    n = w.shape[1]
    tm = _pick_tm(m)
    return pl.pallas_call(
        _mm_bias_relu_kernel,
        grid=(m // tm,),
        in_specs=[
            pl.BlockSpec((tm, k), lambda i: (i, 0)),
            pl.BlockSpec((k, n), lambda i: (0, 0)),
            pl.BlockSpec((1, n), lambda i: (0, 0)),
        ],
        out_specs=pl.BlockSpec((tm, n), lambda i: (i, 0)),
        out_shape=jax.ShapeDtypeStruct((m, n), jnp.float32),
        compiler_params=pltpu.CompilerParams(dimension_semantics=("parallel",)),
    )(patches, w, b)


def _conv_mm_shortcut_relu(patches, w, b, sc, ws, bs):
    m, k = patches.shape
    n = w.shape[1]
    ks = sc.shape[1]
    tm = _pick_tm(m)
    return pl.pallas_call(
        _mm_bias_add_relu_kernel,
        grid=(m // tm,),
        in_specs=[
            pl.BlockSpec((tm, k), lambda i: (i, 0)),
            pl.BlockSpec((k, n), lambda i: (0, 0)),
            pl.BlockSpec((1, n), lambda i: (0, 0)),
            pl.BlockSpec((tm, ks), lambda i: (i, 0)),
            pl.BlockSpec((ks, n), lambda i: (0, 0)),
            pl.BlockSpec((1, n), lambda i: (0, 0)),
        ],
        out_specs=pl.BlockSpec((tm, n), lambda i: (i, 0)),
        out_shape=jax.ShapeDtypeStruct((m, n), jnp.float32),
        compiler_params=pltpu.CompilerParams(dimension_semantics=("parallel",)),
    )(patches, w, b, sc, ws, bs)


# ----------------------------------------------------------------------------
# Glue: im2col, BN folding, parameter prep
# ----------------------------------------------------------------------------
def _im2col_3x3(x_nhwc, stride):
    """3x3 / pad=1 patch extraction on NHWC; feature order is (kh, kw, cin)."""
    b, h, w, c = x_nhwc.shape
    ho = (h - 1) // stride + 1      # floor((h + 2 - 3)/stride) + 1
    wo = (w - 1) // stride + 1
    xp = jnp.pad(x_nhwc, ((0, 0), (1, 1), (1, 1), (0, 0)))
    cols = [
        xp[:, kh:kh + stride * (ho - 1) + 1:stride,
              kw:kw + stride * (wo - 1) + 1:stride, :]
        for kh in range(3) for kw in range(3)
    ]
    patches = jnp.concatenate(cols, axis=-1)            # (b, ho, wo, 9*c)
    return patches.reshape(b * ho * wo, 9 * c), (ho, wo)


def _fold_bn(w_oihw, gamma, beta, mean, var, eps=1e-5):
    """Fold eval-mode BatchNorm2d into the preceding bias-free conv."""
    scale = gamma / jnp.sqrt(var + eps)
    return w_oihw * scale[:, None, None, None], beta - mean * scale


def prepare_kernel_params(p, *, use_proj, eps=1e-5):
    """Fold BN, transpose to (K, N) matmul layout, zero-pad to lane-dense shapes."""
    cout, cin = p["conv1_w"].shape[:2]
    cp = _round_up(cout, 128)

    # conv1 + BN1
    w1, b1 = _fold_bn(p["conv1_w"], p["bn1_gamma"], p["bn1_beta"],
                      p["bn1_mean"], p["bn1_var"], eps)
    w1m = jnp.transpose(w1, (2, 3, 1, 0)).reshape(9 * cin, cout)   # (kh,kw,cin) order
    w1m = _pad_axis(_pad_axis(w1m, 0, _round_up(9 * cin, 128)), 1, cp)
    b1m = _pad_axis(b1.reshape(1, cout), 1, cp)

    # conv2 + BN2 (its input channels are the lane-padded cp channels of h)
    w2, b2 = _fold_bn(p["conv2_w"], p["bn2_gamma"], p["bn2_beta"],
                      p["bn2_mean"], p["bn2_var"], eps)
    w2t = jnp.transpose(w2, (2, 3, 1, 0))                          # (3,3,cout,cout)
    w2p = jnp.zeros((3, 3, cp, cp), jnp.float32).at[:, :, :cout, :cout].set(w2t)
    w2m = w2p.reshape(9 * cp, cp)
    b2m = _pad_axis(b2.reshape(1, cout), 1, cp)

    # shortcut: 1x1 conv + BN projection, or identity -- always a matmul
    if use_proj:
        ws, bs = _fold_bn(p["convs_w"], p["bns_gamma"], p["bns_beta"],
                          p["bns_mean"], p["bns_var"], eps)
        wsm = jnp.transpose(ws[:, :, 0, 0], (1, 0))                # (cin, cout)
        wsm = _pad_axis(_pad_axis(wsm, 0, _round_up(cin, 128)), 1, cp)
        bsm = _pad_axis(bs.reshape(1, cout), 1, cp)
    else:
        wsm = jnp.eye(cp, dtype=jnp.float32)
        bsm = jnp.zeros((1, cp), jnp.float32)

    return {"w1": w1m, "b1": b1m, "w2": w2m, "b2": b2m, "ws": wsm, "bs": bsm}


# ----------------------------------------------------------------------------
# Forward passes
# ----------------------------------------------------------------------------
def residual_block_pallas(x_nchw, kp, *, stride, cout, use_proj):
    x = jnp.transpose(x_nchw, (0, 2, 3, 1)).astype(jnp.float32)    # NCHW -> NHWC
    b = x.shape[0]
    cp = kp["b1"].shape[1]

    # conv1 + BN1 + ReLU: one fused Pallas matmul
    p1, (ho, wo) = _im2col_3x3(x, stride)
    p1 = _pad_axis(p1, 1, kp["w1"].shape[0])
    h = _conv_mm_relu(p1, kp["w1"], kp["b1"])                      # (b*ho*wo, cp)
    h = h.reshape(b, ho, wo, cp)     # channels stay lane-padded (zeros past cout)

    # conv2 + BN2 + shortcut + add + ReLU: one fused Pallas matmul
    p2, _ = _im2col_3x3(h, 1)                                      # K = 9*cp
    p2 = _pad_axis(p2, 1, kp["w2"].shape[0])
    if use_proj:
        xs = x[:, ::stride, ::stride, :][:, :ho, :wo, :]           # 1x1-conv taps
    else:
        xs = x                                                     # identity path
    sc = _pad_axis(xs, 3, kp["ws"].shape[0]).reshape(b * ho * wo, -1)
    out = _conv_mm_shortcut_relu(p2, kp["w2"], kp["b2"], sc, kp["ws"], kp["bs"])
    out = out.reshape(b, ho, wo, cp)[:, :, :, :cout]
    return jnp.transpose(out, (0, 3, 1, 2))                        # NHWC -> NCHW


def residual_block_reference(x, p, *, stride, use_proj, eps=1e-5):
    """Pure-JAX reference (NCHW, mirrors the PyTorch module in eval mode)."""
    def conv(v, w, s, pad):
        return lax.conv_general_dilated(
            v, w, (s, s), pad, dimension_numbers=("NCHW", "OIHW", "NCHW"))

    def bn(v, prefix):
        g, b_, m, var = (p[f"{prefix}_{k}"] for k in ("gamma", "beta", "mean", "var"))
        scale = g / jnp.sqrt(var + eps)
        return v * scale[None, :, None, None] + (b_ - m * scale)[None, :, None, None]

    out = jax.nn.relu(bn(conv(x, p["conv1_w"], stride, ((1, 1), (1, 1))), "bn1"))
    out = bn(conv(out, p["conv2_w"], 1, ((1, 1), (1, 1))), "bn2")
    sc = bn(conv(x, p["convs_w"], stride, "VALID"), "bns") if use_proj else x
    return jax.nn.relu(out + sc)


def init_params(key, cin, cout, use_proj):
    """Deterministic synthetic parameters in PyTorch layouts."""
    keys = iter(jax.random.split(key, 20))

    def conv_w(shape, fan_in):
        return jax.random.normal(next(keys), shape, jnp.float32) / np.sqrt(float(fan_in))

    def bn_params(prefix, c):
        return {
            f"{prefix}_gamma": jax.random.uniform(next(keys), (c,), jnp.float32, 0.5, 1.5),
            f"{prefix}_beta": 0.1 * jax.random.normal(next(keys), (c,), jnp.float32),
            f"{prefix}_mean": 0.1 * jax.random.normal(next(keys), (c,), jnp.float32),
            f"{prefix}_var": jax.random.uniform(next(keys), (c,), jnp.float32, 0.5, 1.5),
        }

    p = {"conv1_w": conv_w((cout, cin, 3, 3), 9 * cin)}
    p.update(bn_params("bn1", cout))
    p["conv2_w"] = conv_w((cout, cout, 3, 3), 9 * cout)
    p.update(bn_params("bn2", cout))
    if use_proj:
        p["convs_w"] = conv_w((cout, cin, 1, 1), cin)
        p.update(bn_params("bns", cout))
    return p


if __name__ == "__main__":
    key = jax.random.PRNGKey(0)
    # (cin, cout, stride): projection-shortcut case and identity-shortcut case.
    cases = [(4, 8, 2), (8, 8, 1)]
    for idx, (cin, cout, stride) in enumerate(cases):
        use_proj = (stride != 1) or (cin != cout)
        pkey, xkey = jax.random.split(jax.random.fold_in(key, idx))
        raw = init_params(pkey, cin, cout, use_proj)
        kp = prepare_kernel_params(raw, use_proj=use_proj)
        x = jax.random.normal(xkey, (2, cin, 16, 16), jnp.float32)

        fwd = jax.jit(functools.partial(
            residual_block_pallas, stride=stride, cout=cout, use_proj=use_proj))
        ref_fn = jax.jit(functools.partial(
            residual_block_reference, stride=stride, use_proj=use_proj))

        out = jax.block_until_ready(fwd(x, kp))
        ref = jax.block_until_ready(ref_fn(x, raw))
        assert out.shape == ref.shape and out.dtype == jnp.float32
        # Tolerance covers default (bf16-pass) MXU precision on both sides.
        np.testing.assert_allclose(np.asarray(out), np.asarray(ref),
                                   rtol=5e-2, atol=5e-2)
    print("KERNEL_OK")
</pallas_src>

<mosaic_0001>
module attributes {stable_mosaic.version = 11 : i64} {
  func.func @_mm_bias_relu_kernel(%arg0: i32, %arg1: memref<64x128xf32, #tpu.memory_space<vmem>>, %arg2: memref<128x128xf32, #tpu.memory_space<vmem>>, %arg3: memref<1x128xf32, #tpu.memory_space<vmem>>, %arg4: memref<64x128xf32, #tpu.memory_space<vmem>>) attributes {dimension_semantics = [#tpu.dimension_semantics<parallel>], iteration_bounds = array<i64: 2>, scalar_prefetch = 0 : i64, scratch_operands = 0 : i64, tpu.core_type = #tpu.core_type<tc>, window_params = [{transform_indices = @transform_0, window_bounds = array<i64: 64, 128>}, {pipeline_mode = #tpu.pipeline_mode<synchronous>, transform_indices = @transform_1, window_bounds = array<i64: 128, 128>}, {pipeline_mode = #tpu.pipeline_mode<synchronous>, transform_indices = @transform_2, window_bounds = array<i64: 1, 128>}, {transform_indices = @transform_3, window_bounds = array<i64: 64, 128>}]} {
    %c0 = arith.constant 0 : index
    %c0_0 = arith.constant 0 : index
    %0 = vector.load %arg1[%c0, %c0_0] : memref<64x128xf32, #tpu.memory_space<vmem>>, vector<64x128xf32>
    %c0_1 = arith.constant 0 : index
    %c0_2 = arith.constant 0 : index
    %1 = vector.load %arg2[%c0_1, %c0_2] : memref<128x128xf32, #tpu.memory_space<vmem>>, vector<128x128xf32>
    %cst = arith.constant dense<0.000000e+00> : vector<64x128xf32>
    %2 = tpu.matmul %0, %1, %cst {dimension_numbers = #tpu.dot_dimension_numbers<[1], [0], [0], [1], [0, 0, 1, 1], [], []>} : vector<64x128xf32>, vector<128x128xf32>, vector<64x128xf32> -> vector<64x128xf32>
    %c0_3 = arith.constant 0 : index
    %c0_4 = arith.constant 0 : index
    %3 = vector.load %arg3[%c0_3, %c0_4] : memref<1x128xf32, #tpu.memory_space<vmem>>, vector<1x128xf32>
    %4 = vector.broadcast %3 : vector<1x128xf32> to vector<64x128xf32>
    %5 = arith.addf %2, %4 : vector<64x128xf32>
    %cst_5 = arith.constant 0.000000e+00 : f32
    %6 = vector.broadcast %cst_5 : f32 to vector<64x128xf32>
    %7 = arith.maximumf %5, %6 : vector<64x128xf32>
    %c0_6 = arith.constant 0 : index
    %c0_7 = arith.constant 0 : index
    %8 = vector.load %arg4[%c0_6, %c0_7] : memref<64x128xf32, #tpu.memory_space<vmem>>, vector<64x128xf32>
    tpu.vector_store %arg4[%c0_6, %c0_7], %7 {strides = array<i32>} : memref<64x128xf32, #tpu.memory_space<vmem>>, vector<64x128xf32>,
    return
  }
  func.func @transform_0(%arg0: i32) -> (i32, i32) {
    %c0_i32 = arith.constant 0 : i32
    %c0_i32_0 = arith.constant 0 : i32
    return %arg0, %c0_i32 : i32, i32
  }
  func.func @transform_1(%arg0: i32) -> (i32, i32) {
    %c0_i32 = arith.constant 0 : i32
    %c0_i32_0 = arith.constant 0 : i32
    %c0_i32_1 = arith.constant 0 : i32
    return %c0_i32, %c0_i32_0 : i32, i32
  }
  func.func @transform_2(%arg0: i32) -> (i32, i32) {
    %c0_i32 = arith.constant 0 : i32
    %c0_i32_0 = arith.constant 0 : i32
    %c0_i32_1 = arith.constant 0 : i32
    return %c0_i32, %c0_i32_0 : i32, i32
  }
  func.func @transform_3(%arg0: i32) -> (i32, i32) {
    %c0_i32 = arith.constant 0 : i32
    %c0_i32_0 = arith.constant 0 : i32
    return %arg0, %c0_i32 : i32, i32
  }
}

module attributes {stable_mosaic.version = 11 : i64} {
  func.func @_mm_bias_add_relu_kernel(%arg0: i32, %arg1: memref<64x1152xf32, #tpu.memory_space<vmem>>, %arg2: memref<1152x128xf32, #tpu.memory_space<vmem>>, %arg3: memref<1x128xf32, #tpu.memory_space<vmem>>, %arg4: memref<64x128xf32, #tpu.memory_space<vmem>>, %arg5: memref<128x128xf32, #tpu.memory_space<vmem>>, %arg6: memref<1x128xf32, #tpu.memory_space<vmem>>, %arg7: memref<64x128xf32, #tpu.memory_space<vmem>>) attributes {dimension_semantics = [#tpu.dimension_semantics<parallel>], iteration_bounds = array<i64: 2>, scalar_prefetch = 0 : i64, scratch_operands = 0 : i64, tpu.core_type = #tpu.core_type<tc>, window_params = [{transform_indices = @transform_0, window_bounds = array<i64: 64, 1152>}, {pipeline_mode = #tpu.pipeline_mode<synchronous>, transform_indices = @transform_1, window_bounds = array<i64: 1152, 128>}, {pipeline_mode = #tpu.pipeline_mode<synchronous>, transform_indices = @transform_2, window_bounds = array<i64: 1, 128>}, {transform_indices = @transform_3, window_bounds = array<i64: 64, 128>}, {pipeline_mode = #tpu.pipeline_mode<synchronous>, transform_indices = @transform_4, window_bounds = array<i64: 128, 128>}, {pipeline_mode = #tpu.pipeline_mode<synchronous>, transform_indices = @transform_5, window_bounds = array<i64: 1, 128>}, {transform_indices = @transform_6, window_bounds = array<i64: 64, 128>}]} {
    %c0 = arith.constant 0 : index
    %c0_0 = arith.constant 0 : index
    %0 = vector.load %arg1[%c0, %c0_0] : memref<64x1152xf32, #tpu.memory_space<vmem>>, vector<64x1152xf32>
    %c0_1 = arith.constant 0 : index
    %c0_2 = arith.constant 0 : index
    %1 = vector.load %arg2[%c0_1, %c0_2] : memref<1152x128xf32, #tpu.memory_space<vmem>>, vector<1152x128xf32>
    %cst = arith.constant dense<0.000000e+00> : vector<64x128xf32>
    %2 = tpu.matmul %0, %1, %cst {dimension_numbers = #tpu.dot_dimension_numbers<[1], [0], [0], [1], [0, 0, 1, 1], [], []>} : vector<64x1152xf32>, vector<1152x128xf32>, vector<64x128xf32> -> vector<64x128xf32>
    %c0_3 = arith.constant 0 : index
    %c0_4 = arith.constant 0 : index
    %3 = vector.load %arg3[%c0_3, %c0_4] : memref<1x128xf32, #tpu.memory_space<vmem>>, vector<1x128xf32>
    %4 = vector.broadcast %3 : vector<1x128xf32> to vector<64x128xf32>
    %5 = arith.addf %2, %4 : vector<64x128xf32>
    %c0_5 = arith.constant 0 : index
    %c0_6 = arith.constant 0 : index
    %6 = vector.load %arg4[%c0_5, %c0_6] : memref<64x128xf32, #tpu.memory_space<vmem>>, vector<64x128xf32>
    %c0_7 = arith.constant 0 : index
    %c0_8 = arith.constant 0 : index
    %7 = vector.load %arg5[%c0_7, %c0_8] : memref<128x128xf32, #tpu.memory_space<vmem>>, vector<128x128xf32>
    %cst_9 = arith.constant dense<0.000000e+00> : vector<64x128xf32>
    %8 = tpu.matmul %6, %7, %cst_9 {dimension_numbers = #tpu.dot_dimension_numbers<[1], [0], [0], [1], [0, 0, 1, 1], [], []>} : vector<64x128xf32>, vector<128x128xf32>, vector<64x128xf32> -> vector<64x128xf32>
    %9 = arith.addf %5, %8 : vector<64x128xf32>
    %c0_10 = arith.constant 0 : index
    %c0_11 = arith.constant 0 : index
    %10 = vector.load %arg6[%c0_10, %c0_11] : memref<1x128xf32, #tpu.memory_space<vmem>>, vector<1x128xf32>
    %11 = vector.broadcast %10 : vector<1x128xf32> to vector<64x128xf32>
    %12 = arith.addf %9, %11 : vector<64x128xf32>
    %cst_12 = arith.constant 0.000000e+00 : f32
    %13 = vector.broadcast %cst_12 : f32 to vector<64x128xf32>
    %14 = arith.maximumf %12, %13 : vector<64x128xf32>
    %c0_13 = arith.constant 0 : index
    %c0_14 = arith.constant 0 : index
    %15 = vector.load %arg7[%c0_13, %c0_14] : memref<64x128xf32, #tpu.memory_space<vmem>>, vector<64x128xf32>
    tpu.vector_store %arg7[%c0_13, %c0_14], %14 {strides = array<i32>} : memref<64x128xf32, #tpu.memory_space<vmem>>, vector<64x128xf32>,
    return
  }
  func.func @transform_0(%arg0: i32) -> (i32, i32) {
    %c0_i32 = arith.constant 0 : i32
    %c0_i32_0 = arith.constant 0 : i32
    return %arg0, %c0_i32 : i32, i32
  }
  func.func @transform_1(%arg0: i32) -> (i32, i32) {
    %c0_i32 = arith.constant 0 : i32
    %c0_i32_0 = arith.constant 0 : i32
    %c0_i32_1 = arith.constant 0 : i32
    return %c0_i32, %c0_i32_0 : i32, i32
  }
  func.func @transform_2(%arg0: i32) -> (i32, i32) {
    %c0_i32 = arith.constant 0 : i32
    %c0_i32_0 = arith.constant 0 : i32
    %c0_i32_1 = arith.constant 0 : i32
    return %c0_i32, %c0_i32_0 : i32, i32
  }
  func.func @transform_3(%arg0: i32) -> (i32, i32) {
    %c0_i32 = arith.constant 0 : i32
    %c0_i32_0 = arith.constant 0 : i32
    return %arg0, %c0_i32 : i32, i32
  }
  func.func @transform_4(%arg0: i32) -> (i32, i32) {
    %c0_i32 = arith.constant 0 : i32
    %c0_i32_0 = arith.constant 0 : i32
    %c0_i32_1 = arith.constant 0 : i32
    return %c0_i32, %c0_i32_0 : i32, i32
  }
  func.func @transform_5(%arg0: i32) -> (i32, i32) {
    %c0_i32 = arith.constant 0 : i32
    %c0_i32_0 = arith.constant 0 : i32
    %c0_i32_1 = arith.constant 0 : i32
    return %c0_i32, %c0_i32_0 : i32, i32
  }
  func.func @transform_6(%arg0: i32) -> (i32, i32) {
    %c0_i32 = arith.constant 0 : i32
    %c0_i32_0 = arith.constant 0 : i32
    return %arg0, %c0_i32 : i32, i32
  }
}

</mosaic_0001>

<bundles_post_ra>
// kernel: residual_block_pallas.2
= control target key start
LH: loop header
LB: loop body
LE: loop exit
PB: predicated region body
PF: predicated region fallthrough
CT: control target
= control target key end

     0   :  { %s546_s12 = smov 0   ;;  %s631_s0 = inlined_call_operand.vmem [shape: f32[128,128], index: 0, kind: input, shape index: {}]   ;;  %s632_s1 = inlined_call_operand.vmem [shape: f32[128,128], index: 1, kind: input, shape index: {}]   ;;  %s633_s2 = inlined_call_operand.vmem [shape: f32[1,128], index: 2, kind: input, shape index: {}]   ;;  %s634_s3 = inlined_call_operand.vmem [shape: f32[128,128], index: 3, kind: output, shape index: {}]  }
   0x1 LB: > { %s382_s13 = sadd.s32 4294967295, %s524_s12   ;;  %p386_p0 = scmp.ge.s32.totalorder %s524_s12, 1  ;;  %s524_s12 = sphi %s546_s12, %s13_s12  }
   0x2   : > { %p138_p1 = scmp.lt.s32.totalorder %s524_s12, 3 }
   0x4   : > { %p139_p2 = pnand %p386_p0, %p138_p1 }
   0x5   : > { %v182_v0 = vld [vmem:[%s632_s1] sm:$0xff] (!%p139_p2)  ;;  %v183_v1 = vld [vmem:[%s632_s1 + $0x8] sm:$0xff] (!%p139_p2)  ;;  %v184_v2 = vld [vmem:[%s632_s1 + $0x10] sm:$0xff] (!%p139_p2)  ;;  %s387_s20 = sshll.u32 (!%p139_p2), %s382_s13, 3 }
   0x6   : > { %142 = sbr.rel (%p139_p2) target bundleno = 263 (0x107), region = 32  ;;  %v462_v3 = vpack.c.bf16 (!%p139_p2), %v183_v1, %v182_v0  ;;  %v185_v4 = vld [vmem:[%s632_s1 + $0x18] sm:$0xff] (!%p139_p2)  ;;  %p163_p3 = scmp.lt.s32.totalorder (!%p139_p2), %s387_s20, 15  ;;  %v186_v6 = vld [vmem:[%s632_s1 + $0x20] sm:$0xff] (!%p139_p2)  ;;  %v187_v7 = vld [vmem:[%s632_s1 + $0x28] sm:$0xff] (!%p139_p2) }
   0x7   : > { %v466_v5 = vpack.c.bf16 (!%p139_p2), %v185_v4, %v184_v2  ;;  %v470_v8 = vpack.c.bf16 (!%p139_p2), %v187_v7, %v186_v6  ;;  %v188_v9 = vld [vmem:[%s632_s1 + $0x30] sm:$0xff] (!%p139_p2)  ;;  %v189_v10 = vld [vmem:[%s632_s1 + $0x38] sm:$0xff] (!%p139_p2)  ;;  %v190_v14 = vld [vmem:[%s632_s1 + $0x40] sm:$0xff] (!%p139_p2) }
   0x8   : > { %463 = vmatprep.subr.bf16.mxu0 (!%p139_p2), %v462_v3  ;;  %494 = vmatprep.subr.bf16.mxu1 (!%p139_p2), %v462_v3  ;;  %v474_v13 = vpack.c.bf16 (!%p139_p2), %v189_v10, %v188_v9  ;;  %v191_v15 = vld [vmem:[%s632_s1 + $0x48] sm:$0xff] (!%p139_p2)  ;;  %v192_v17 = vld [vmem:[%s632_s1 + $0x50] sm:$0xff] (!%p139_p2)  ;;  %v193_v18 = vld [vmem:[%s632_s1 + $0x58] sm:$0xff] (!%p139_p2) }
   0x9   : > { %465 = vmatpush3.bf16.msra.mxu0 (!%p139_p2), %v462_v3  ;;  %502 = vmatpush3.bf16.msra.mxu1 (!%p139_p2), %v462_v3  ;;  %v478_v16 = vpack.c.bf16 (!%p139_p2), %v191_v15, %v190_v14  ;;  %v482_v19 = vpack.c.bf16 (!%p139_p2), %v193_v18, %v192_v17  ;;  %v194_v20 = vld [vmem:[%s632_s1 + $0x60] sm:$0xff] (!%p139_p2)  ;;  %v195_v21 = vld [vmem:[%s632_s1 + $0x68] sm:$0xff] (!%p139_p2)  ;;  %v196_v23 = vld [vmem:[%s632_s1 + $0x70] sm:$0xff] (!%p139_p2) }
   0xa   : > { %467 = vmatprep.subr.bf16.mxu0 (!%p139_p2), %v466_v5  ;;  %495 = vmatprep.subr.bf16.mxu1 (!%p139_p2), %v466_v5  ;;  %v486_v22 = vpack.c.bf16 (!%p139_p2), %v195_v21, %v194_v20  ;;  %v197_v24 = vld [vmem:[%s632_s1 + $0x78] sm:$0xff] (!%p139_p2)  ;;  %v391_v32 = vld [vmem:[%s633_s2] ss:$0 sm:$0xff] (!%p139_p2) }
   0xb   : > { %v490_v25 = vpack.c.bf16 (!%p139_p2), %v197_v24, %v196_v23 }
   0xd   : > { %s636_s20 = smov (!%p163_p3, %s387_s20), 15  ;;  %469 = vmatpush3.bf16.msra.mxu0 %v466_v5  ;;  %503 = vmatpush3.bf16.msra.mxu1 %v466_v5 }
   0xe   : > { %s388_s27 = sshll.u32 %s636_s20, 3  ;;  %471 = vmatprep.subr.bf16.mxu0 %v470_v8  ;;  %496 = vmatprep.subr.bf16.mxu1 %v470_v8 }
   0xf   : > { %s586_s7 = scalar_lea.vmem %s631_s0, %s388_s27  ;;  %s172_s4 = scalar_lea.vmem %s634_s3, %s388_s27 }
  0x10   : > { %v174_v11 = vld [vmem:[%s586_s7] sm:$0xff]  ;;  %v175_v26 = vld [vmem:[%s586_s7 + $0x8] sm:$0xff]  ;;  %v176_v28 = vld [vmem:[%s586_s7 + $0x10] sm:$0xff] }
  0x11   : > { %v178_v12 = vld [vmem:[%s586_s7 + $0x20] sm:$0xff]  ;;  %450 = vmatprep.mubr.f32.mxu0 %v174_v11  ;;  %473 = vmatpush3.bf16.msra.mxu0 %v470_v8  ;;  %v179_v27 = vld [vmem:[%s586_s7 + $0x28] sm:$0xff]  ;;  %v180_v29 = vld [vmem:[%s586_s7 + $0x30] sm:$0xff] }
  0x12   : > { %456 = vmatprep.mubr.f32.mxu1 %v178_v12  ;;  %504 = vmatpush3.bf16.msra.mxu1 %v470_v8  ;;  %v177_v30 = vld [vmem:[%s586_s7 + $0x18] sm:$0xff] }
  0x13   : > { %475 = vmatprep.subr.bf16.mxu0 %v474_v13  ;;  %497 = vmatprep.subr.bf16.mxu1 %v474_v13  ;;  %v181_v31 = vld [vmem:[%s586_s7 + $0x38] sm:$0xff] }
  0x15   : > { %477 = vmatpush3.bf16.msra.mxu0 %v474_v13 }
  0x16   : > { %505 = vmatpush3.bf16.msra.mxu1 %v474_v13  ;;  %479 = vmatprep.subr.bf16.mxu0 %v478_v16 }
  0x17   : > { %498 = vmatprep.subr.bf16.mxu1 %v478_v16 }
  0x19   : > { %481 = vmatpush3.bf16.msra.mxu0 %v478_v16 }
  0x1a   : > { %506 = vmatpush3.bf16.msra.mxu1 %v478_v16  ;;  %483 = vmatprep.subr.bf16.mxu0 %v482_v19 }
  0x1b   : > { %499 = vmatprep.subr.bf16.mxu1 %v482_v19 }
  0x1d   : > { %485 = vmatpush3.bf16.msra.mxu0 %v482_v19 }
  0x1e   : > { %507 = vmatpush3.bf16.msra.mxu1 %v482_v19  ;;  %487 = vmatprep.subr.bf16.mxu0 %v486_v22 }
  0x1f   : > { %500 = vmatprep.subr.bf16.mxu1 %v486_v22 }
  0x21   : > { %489 = vmatpush3.bf16.msra.mxu0 %v486_v22 }
  0x22   : > { %508 = vmatpush3.bf16.msra.mxu1 %v486_v22  ;;  %491 = vmatprep.subr.bf16.mxu0 %v490_v25 }
  0x23   : > { %501 = vmatprep.subr.bf16.mxu1 %v490_v25 }
  0x25   : > { %493 = vmatpush3.bf16.msra.mxu0 %v490_v25 }
  0x26   : > { %509 = vmatpush3.bf16.msra.mxu1 %v490_v25 }
  0x28   : > { %451 = vmatmul.mubr.f32.vlgmr.msra.gmra.mrb[0].mxu0 %v175_v26 }
  0x29   : > { %457 = vmatmul.mubr.f32.vlgmr.msra.gmra.mrb[0].mxu1 %v179_v27  ;;  %453 = vmatprep.mubr.f32.mxu0 %v176_v28 }
  0x2a   : > { %459 = vmatprep.mubr.f32.mxu1 %v180_v29 }
  0x2c   : > { %454 = vmatmul.mubr.f32.gmra.mrb[2].mxu0 %v177_v30 }
  0x2d   : > { %460 = vmatmul.mubr.f32.gmra.mrb[2].mxu1 %v181_v31 }
  0xfb   : > { %v452_v33 = vpop.f32.mrb[0].mxu0 }
  0xfc   : > { %v458_v34 = vpop.f32.mrb[0].mxu1  ;;  %v277_v35 = vadd.f32 %v452_v33, %v391_v32  ;;  %v271_v37 = vpop.f32.mrb[1].mxu0 }
  0xfd   : > { %v297_v36 = vadd.f32 %v458_v34, %v391_v32  ;;  %v291_v38 = vpop.f32.mrb[1].mxu1  ;;  %v272_v39 = vadd.f32 %v391_v32, %v271_v37 }
  0xfe   : > { %v292_v40 = vadd.f32 %v391_v32, %v291_v38  ;;  %v311_v41 = vmax.f32 %v277_v35, 0.0 }
  0xff   : > { %v315_v42 = vmax.f32 %v297_v36, 0.0  ;;  %v310_v43 = vmax.f32 %v272_v39, 0.0  ;;  %v455_v45 = vpop.f32.mrb[2].mxu0 }
 0x100   : > { %v314_v44 = vmax.f32 %v292_v40, 0.0  ;;  %v461_v46 = vpop.f32.mrb[2].mxu1  ;;  %319 = vst [vmem:[%s172_s4 + $0x8] sm:$0xff] %v311_v41  ;;  %v287_v47 = vadd.f32 %v455_v45, %v391_v32  ;;  %v281_v49 = vpop.f32.mrb[3].mxu0 }
 0x101   : > { %323 = vst [vmem:[%s172_s4 + $0x28] sm:$0xff] %v315_v42  ;;  %v307_v48 = vadd.f32 %v461_v46, %v391_v32  ;;  %v301_v50 = vpop.f32.mrb[3].mxu1  ;;  %318 = vst [vmem:[%s172_s4] sm:$0xff] %v310_v43  ;;  %v282_v51 = vadd.f32 %v391_v32, %v281_v49 }
 0x102   : > { %322 = vst [vmem:[%s172_s4 + $0x20] sm:$0xff] %v314_v44  ;;  %v302_v52 = vadd.f32 %v391_v32, %v301_v50  ;;  %v313_v53 = vmax.f32 %v287_v47, 0.0 }
 0x103   : > { %v317_v54 = vmax.f32 %v307_v48, 0.0  ;;  %v312_v55 = vmax.f32 %v282_v51, 0.0 }
 0x104   : > { %v316_v56 = vmax.f32 %v302_v52, 0.0  ;;  %321 = vst [vmem:[%s172_s4 + $0x18] sm:$0xff] %v313_v53 }
 0x105   : > { %325 = vst [vmem:[%s172_s4 + $0x38] sm:$0xff] %v317_v54  ;;  %320 = vst [vmem:[%s172_s4 + $0x10] sm:$0xff] %v312_v55 }
 0x106   : > { %324 = vst [vmem:[%s172_s4 + $0x30] sm:$0xff] %v316_v56 }
 0x107 PF: > { %s13_s12 = sadd.s32 1, %s524_s12  }
 0x108   : > { %p10_p4 = scmp.ge.s32.totalorder %s13_s12, 4  }
 0x10a   :  { %12 = sbr.rel (!%p10_p4) target bundleno = 1 (0x1), region = 62 }

// kernel: residual_block_pallas.3
= control target key start
LH: loop header
LB: loop body
LE: loop exit
PB: predicated region body
PF: predicated region fallthrough
CT: control target
= control target key end

     0   :  { %s1899_s21 = smov 0   ;;  %s2513_s0 = inlined_call_operand.vmem [shape: f32[128,1152], index: 0, kind: input, shape index: {}]   ;;  %s2514_s1 = inlined_call_operand.vmem [shape: f32[1152,128], index: 1, kind: input, shape index: {}]   ;;  %s2515_s2 = inlined_call_operand.vmem [shape: f32[1,128], index: 2, kind: input, shape index: {}]   ;;  %s2516_s3 = inlined_call_operand.vmem [shape: f32[128,128], index: 3, kind: input, shape index: {}]   ;;  %s2517_s4 = inlined_call_operand.vmem [shape: f32[128,128], index: 4, kind: input, shape index: {}]   ;;  %s2518_s5 = inlined_call_operand.vmem [shape: f32[1,128], index: 5, kind: input, shape index: {}]   ;;  %s2519_s6 = inlined_call_operand.vmem [shape: f32[128,128], index: 6, kind: output, shape index: {}]  }
   0x1 LB: > { %s1264_s22 = sadd.s32 4294967295, %s1862_s21   ;;  %p1268_p0 = scmp.ge.s32.totalorder %s1862_s21, 1  ;;  %s1862_s21 = sphi %s1899_s21, %s16_s21  }
   0x2   : > { %p225_p1 = scmp.lt.s32.totalorder %s1862_s21, 3 }
   0x4   : > { %p226_p2 = pnand %p1268_p0, %p225_p1 }
   0x5   : > { %v368_v0 = vld [vmem:[%s2514_s1 + $0x80] sm:$0xff] (!%p226_p2)  ;;  %v369_v1 = vld [vmem:[%s2514_s1 + $0x88] sm:$0xff] (!%p226_p2)  ;;  %v370_v11 = vld [vmem:[%s2514_s1 + $0x90] sm:$0xff] (!%p226_p2)  ;;  %s1943_s25 = sshll.u32 (!%p226_p2), %s1264_s22, 3 }
   0x6   : > { %229 = sbr.rel (%p226_p2) target bundleno = 340 (0x154), region = 44  ;;  %v400_v2 = vld [vmem:[%s2514_s1 + $0x180] sm:$0xff] (!%p226_p2)  ;;  %v1639_v3 = vpack.c.bf16 (!%p226_p2), %v369_v1, %v368_v0  ;;  %v401_v4 = vld [vmem:[%s2514_s1 + $0x188] sm:$0xff] (!%p226_p2)  ;;  %v371_v13 = vld [vmem:[%s2514_s1 + $0x98] sm:$0xff] (!%p226_p2)  ;;  %p262_p3 = scmp.lt.s32.totalorder (!%p226_p2), %s1943_s25, 15 }
   0x7   : > { %v352_v5 = vld [vmem:[%s2514_s1] sm:$0xff] (!%p226_p2)  ;;  %v353_v6 = vld [vmem:[%s2514_s1 + $0x8] sm:$0xff] (!%p226_p2)  ;;  %v1671_v7 = vpack.c.bf16 (!%p226_p2), %v401_v4, %v400_v2  ;;  %v402_v14 = vld [vmem:[%s2514_s1 + $0x190] sm:$0xff] (!%p226_p2)  ;;  %v1643_v16 = vpack.c.bf16 (!%p226_p2), %v371_v13, %v370_v11 }
   0x8   : > { %v1641_v8 = vpack.c.bf16 (!%p226_p2), %v353_v6, %v352_v5  ;;  %v384_v9 = vld [vmem:[%s2514_s1 + $0x100] sm:$0xff] (!%p226_p2)  ;;  %v385_v10 = vld [vmem:[%s2514_s1 + $0x108] sm:$0xff] (!%p226_p2)  ;;  %1640 = vmatprep.subr.bf16.mxu0 (!%p226_p2), %v1639_v3  ;;  %v403_v15 = vld [vmem:[%s2514_s1 + $0x198] sm:$0xff] (!%p226_p2) }
   0x9   : > { %v1673_v12 = vpack.c.bf16 (!%p226_p2), %v385_v10, %v384_v9  ;;  %1672 = vmatprep.subr.bf16.mxu1 (!%p226_p2), %v1671_v7  ;;  %v1675_v17 = vpack.c.bf16 (!%p226_p2), %v403_v15, %v402_v14  ;;  %v354_v18 = vld [vmem:[%s2514_s1 + $0x10] sm:$0xff] (!%p226_p2)  ;;  %v355_v19 = vld [vmem:[%s2514_s1 + $0x18] sm:$0xff] (!%p226_p2)  ;;  %v372_v23 = vld [vmem:[%s2514_s1 + $0xa0] sm:$0xff] (!%p226_p2) }
   0xa   : > { %1642 = vmatpush3.bf16.msra.mxu0 (!%p226_p2), %v1641_v8  ;;  %v386_v20 = vld [vmem:[%s2514_s1 + $0x110] sm:$0xff] (!%p226_p2)  ;;  %v1645_v21 = vpack.c.bf16 (!%p226_p2), %v355_v19, %v354_v18  ;;  %v387_v22 = vld [vmem:[%s2514_s1 + $0x118] sm:$0xff] (!%p226_p2)  ;;  %v373_v24 = vld [vmem:[%s2514_s1 + $0xa8] sm:$0xff] (!%p226_p2) }
   0xb   : > { %1674 = vmatpush3.bf16.msra.mxu1 (!%p226_p2), %v1673_v12  ;;  %1644 = vmatprep.subr.bf16.mxu0 (!%p226_p2), %v1643_v16  ;;  %v1677_v25 = vpack.c.bf16 (!%p226_p2), %v387_v22, %v386_v20  ;;  %v1647_v26 = vpack.c.bf16 (!%p226_p2), %v373_v24, %v372_v23  ;;  %v404_v27 = vld [vmem:[%s2514_s1 + $0x1a0] sm:$0xff] (!%p226_p2)  ;;  %v405_v28 = vld [vmem:[%s2514_s1 + $0x1a8] sm:$0xff] (!%p226_p2)  ;;  %v374_v35 = vld [vmem:[%s2514_s1 + $0xb0] sm:$0xff] (!%p226_p2) }
   0xc   : > { %1676 = vmatprep.subr.bf16.mxu1 (!%p226_p2), %v1675_v17  ;;  %v356_v29 = vld [vmem:[%s2514_s1 + $0x20] sm:$0xff] (!%p226_p2)  ;;  %v1679_v30 = vpack.c.bf16 (!%p226_p2), %v405_v28, %v404_v27  ;;  %v357_v31 = vld [vmem:[%s2514_s1 + $0x28] sm:$0xff] (!%p226_p2)  ;;  %v375_v36 = vld [vmem:[%s2514_s1 + $0xb8] sm:$0xff] (!%p226_p2) }
   0xd   : > { %v388_v32 = vld [vmem:[%s2514_s1 + $0x120] sm:$0xff]  ;;  %v389_v33 = vld [vmem:[%s2514_s1 + $0x128] sm:$0xff]  ;;  %v1649_v34 = vpack.c.bf16 %v357_v31, %v356_v29  ;;  %v406_v37 = vld [vmem:[%s2514_s1 + $0x1b0] sm:$0xff]  ;;  %v1651_v39 = vpack.c.bf16 %v375_v36, %v374_v35  ;;  %s2521_s25 = smov (!%p262_p3, %s1943_s25), 15 }
   0xe   : > { %1646 = vmatpush3.bf16.msra.mxu0 %v1645_v21  ;;  %v1681_v38 = vpack.c.bf16 %v389_v33, %v388_v32  ;;  %v407_v40 = vld [vmem:[%s2514_s1 + $0x1b8] sm:$0xff]  ;;  %v358_v41 = vld [vmem:[%s2514_s1 + $0x30] sm:$0xff]  ;;  %v376_v46 = vld [vmem:[%s2514_s1 + $0xc0] sm:$0xff]  ;;  %s1847_s17 = smul.u32 72, %s2521_s25  ;;  %s1272_s24 = sshll.u32 %s2521_s25, 3 }
   0xf   : > { %1678 = vmatpush3.bf16.msra.mxu1 %v1677_v25  ;;  %1648 = vmatprep.subr.bf16.mxu0 %v1647_v26  ;;  %v359_v42 = vld [vmem:[%s2514_s1 + $0x38] sm:$0xff]  ;;  %v1683_v43 = vpack.c.bf16 %v407_v40, %v406_v37  ;;  %v390_v44 = vld [vmem:[%s2514_s1 + $0x130] sm:$0xff]  ;;  %v377_v47 = vld [vmem:[%s2514_s1 + $0xc8] sm:$0xff]  ;;  %s2469_s7 = scalar_lea.vmem %s2516_s3, %s1272_s24  ;;  %s2500_s12 = scalar_lea.vmem %s2519_s6, %s1272_s24 }
  0x10   : > { %1680 = vmatprep.subr.bf16.mxu1 %v1679_v30  ;;  %v391_v45 = vld [vmem:[%s2514_s1 + $0x138] sm:$0xff]  ;;  %v408_v48 = vld [vmem:[%s2514_s1 + $0x1c0] sm:$0xff]  ;;  %v409_v49 = vld [vmem:[%s2514_s1 + $0x1c8] sm:$0xff]  ;;  %v1653_v50 = vpack.c.bf16 %v359_v42, %v358_v41  ;;  %v1655_v52 = vpack.c.bf16 %v377_v47, %v376_v46  ;;  %s2069_s14 = scalar_lea.vmem %s2513_s0, %s1847_s17 }
  0x11   : > { %v1685_v51 = vpack.c.bf16 %v391_v45, %v390_v44  ;;  %v360_v53 = vld [vmem:[%s2514_s1 + $0x40] sm:$0xff]  ;;  %v361_v54 = vld [vmem:[%s2514_s1 + $0x48] sm:$0xff]  ;;  %v1687_v56 = vpack.c.bf16 %v409_v49, %v408_v48  ;;  %v378_v58 = vld [vmem:[%s2514_s1 + $0xd0] sm:$0xff] }
  0x12   : > { %1650 = vmatpush3.bf16.msra.mxu0 %v1649_v34  ;;  %v392_v55 = vld [vmem:[%s2514_s1 + $0x140] sm:$0xff]  ;;  %v393_v57 = vld [vmem:[%s2514_s1 + $0x148] sm:$0xff]  ;;  %v379_v59 = vld [vmem:[%s2514_s1 + $0xd8] sm:$0xff]  ;;  %v1657_v62 = vpack.c.bf16 %v361_v54, %v360_v53 }
  0x13   : > { %1682 = vmatpush3.bf16.msra.mxu1 %v1681_v38  ;;  %1652 = vmatprep.subr.bf16.mxu0 %v1651_v39  ;;  %v410_v60 = vld [vmem:[%s2514_s1 + $0x1d0] sm:$0xff]  ;;  %v411_v61 = vld [vmem:[%s2514_s1 + $0x1d8] sm:$0xff]  ;;  %v1689_v63 = vpack.c.bf16 %v393_v57, %v392_v55  ;;  %v1659_v0 = vpack.c.bf16 %v379_v59, %v378_v58  ;;  %v380_v6 = vld [vmem:[%s2514_s1 + $0xe0] sm:$0xff] }
  0x14   : > { %1684 = vmatprep.subr.bf16.mxu1 %v1683_v43  ;;  %v362_v1 = vld [vmem:[%s2514_s1 + $0x50] sm:$0xff]  ;;  %v363_v2 = vld [vmem:[%s2514_s1 + $0x58] sm:$0xff]  ;;  %v1691_v4 = vpack.c.bf16 %v411_v61, %v410_v60  ;;  %v381_v7 = vld [vmem:[%s2514_s1 + $0xe8] sm:$0xff] }
  0x15   : > { %v394_v3 = vld [vmem:[%s2514_s1 + $0x150] sm:$0xff]  ;;  %v395_v5 = vld [vmem:[%s2514_s1 + $0x158] sm:$0xff]  ;;  %v412_v8 = vld [vmem:[%s2514_s1 + $0x1e0] sm:$0xff]  ;;  %v1661_v10 = vpack.c.bf16 %v363_v2, %v362_v1  ;;  %v1663_v14 = vpack.c.bf16 %v381_v7, %v380_v6 }
  0x16   : > { %1654 = vmatpush3.bf16.msra.mxu0 %v1653_v50  ;;  %v413_v9 = vld [vmem:[%s2514_s1 + $0x1e8] sm:$0xff]  ;;  %v364_v11 = vld [vmem:[%s2514_s1 + $0x60] sm:$0xff]  ;;  %v1693_v13 = vpack.c.bf16 %v395_v5, %v394_v3  ;;  %v283_v17 = vld [vmem:[%s2069_s14 + $0x18] sm:$0xff] }
  0x17   : > { %1686 = vmatpush3.bf16.msra.mxu1 %v1685_v51  ;;  %1656 = vmatprep.subr.bf16.mxu0 %v1655_v52  ;;  %v365_v12 = vld [vmem:[%s2514_s1 + $0x68] sm:$0xff]  ;;  %v396_v15 = vld [vmem:[%s2514_s1 + $0x160] sm:$0xff]  ;;  %v1695_v18 = vpack.c.bf16 %v413_v9, %v412_v8  ;;  %v382_v20 = vld [vmem:[%s2514_s1 + $0xf0] sm:$0xff] }
  0x18   : > { %1688 = vmatprep.subr.bf16.mxu1 %v1687_v56  ;;  %v281_v16 = vld [vmem:[%s2069_s14 + $0x8] sm:$0xff]  ;;  %v383_v21 = vld [vmem:[%s2514_s1 + $0xf8] sm:$0xff]  ;;  %v414_v22 = vld [vmem:[%s2514_s1 + $0x1f0] sm:$0xff]  ;;  %672 = vmatprep.mubr.f32.mxu1 %v283_v17  ;;  %v1665_v24 = vpack.c.bf16 %v365_v12, %v364_v11 }
  0x19   : > { %v397_v19 = vld [vmem:[%s2514_s1 + $0x168] sm:$0xff]  ;;  %567 = vmatprep.mubr.f32.mxu0 %v281_v16  ;;  %v415_v23 = vld [vmem:[%s2514_s1 + $0x1f8] sm:$0xff]  ;;  %v1667_v26 = vpack.c.bf16 %v383_v21, %v382_v20  ;;  %v366_v27 = vld [vmem:[%s2514_s1 + $0x70] sm:$0xff] }
  0x1a   : > { %1658 = vmatpush3.bf16.msra.mxu0 %v1657_v62  ;;  %v1697_v25 = vpack.c.bf16 %v397_v19, %v396_v15  ;;  %v367_v28 = vld [vmem:[%s2514_s1 + $0x78] sm:$0xff]  ;;  %v398_v29 = vld [vmem:[%s2514_s1 + $0x170] sm:$0xff]  ;;  %v1699_v30 = vpack.c.bf16 %v415_v23, %v414_v22  ;;  %v432_v32 = vld [vmem:[%s2514_s1 + $0x280] sm:$0xff] }
  0x1b   : > { %1690 = vmatpush3.bf16.msra.mxu1 %v1689_v63  ;;  %1660 = vmatprep.subr.bf16.mxu0 %v1659_v0  ;;  %v399_v31 = vld [vmem:[%s2514_s1 + $0x178] sm:$0xff]  ;;  %v433_v33 = vld [vmem:[%s2514_s1 + $0x288] sm:$0xff]  ;;  %v464_v34 = vld [vmem:[%s2514_s1 + $0x380] sm:$0xff]  ;;  %v1669_v36 = vpack.c.bf16 %v367_v28, %v366_v27 }
  0x1c   : > { %1692 = vmatprep.subr.bf16.mxu1 %v1691_v4  ;;  %v465_v35 = vld [vmem:[%s2514_s1 + $0x388] sm:$0xff]  ;;  %v1701_v37 = vpack.c.bf16 %v399_v31, %v398_v29  ;;  %v1703_v38 = vpack.c.bf16 %v433_v33, %v432_v32  ;;  %v416_v39 = vld [vmem:[%s2514_s1 + $0x200] sm:$0xff]  ;;  %v434_v44 = vld [vmem:[%s2514_s1 + $0x290] sm:$0xff] }
  0x1d   : > { %v417_v40 = vld [vmem:[%s2514_s1 + $0x208] sm:$0xff]  ;;  %v1735_v41 = vpack.c.bf16 %v465_v35, %v464_v34  ;;  %v448_v42 = vld [vmem:[%s2514_s1 + $0x300] sm:$0xff]  ;;  %v435_v45 = vld [vmem:[%s2514_s1 + $0x298] sm:$0xff] }
  0x1e   : > { %1662 = vmatpush3.bf16.msra.mxu0 %v1661_v10  ;;  %v449_v43 = vld [vmem:[%s2514_s1 + $0x308] sm:$0xff]  ;;  %v280_v46 = vld [vmem:[%s2069_s14] sm:$0xff]  ;;  %v1705_v47 = vpack.c.bf16 %v417_v40, %v416_v39  ;;  %v466_v48 = vld [vmem:[%s2514_s1 + $0x390] sm:$0xff]  ;;  %v1707_v55 = vpack.c.bf16 %v435_v45, %v434_v44 }
  0x1f   : > { %1694 = vmatpush3.bf16.msra.mxu1 %v1693_v13  ;;  %1664 = vmatprep.subr.bf16.mxu0 %v1663_v14  ;;  %v467_v49 = vld [vmem:[%s2514_s1 + $0x398] sm:$0xff]  ;;  %v282_v50 = vld [vmem:[%s2069_s14 + $0x10] sm:$0xff]  ;;  %v1737_v51 = vpack.c.bf16 %v449_v43, %v448_v42  ;;  %v292_v58 = vld [vmem:[%s2069_s14 + $0x60] sm:$0xff] }
  0x20   : > { %1696 = vmatprep.subr.bf16.mxu1 %v1695_v18  ;;  %v418_v52 = vld [vmem:[%s2514_s1 + $0x210] sm:$0xff]  ;;  %v419_v53 = vld [vmem:[%s2514_s1 + $0x218] sm:$0xff]  ;;  %v1739_v59 = vpack.c.bf16 %v467_v49, %v466_v48  ;;  %v436_v60 = vld [vmem:[%s2514_s1 + $0x2a0] sm:$0xff] }
  0x21   : > { %v290_v54 = vld [vmem:[%s2069_s14 + $0x50] sm:$0xff]  ;;  %v451_v57 = vld [vmem:[%s2514_s1 + $0x318] sm:$0xff]  ;;  %v437_v61 = vld [vmem:[%s2514_s1 + $0x2a8] sm:$0xff]  ;;  %v1709_v63 = vpack.c.bf16 %v419_v53, %v418_v52 }
  0x22   : > { %1666 = vmatpush3.bf16.msra.mxu0 %v1665_v24  ;;  %v450_v56 = vld [vmem:[%s2514_s1 + $0x310] sm:$0xff]  ;;  %v289_v62 = vld [vmem:[%s2069_s14 + $0x48] sm:$0xff]  ;;  %v468_v0 = vld [vmem:[%s2514_s1 + $0x3a0] sm:$0xff]  ;;  %v1711_v7 = vpack.c.bf16 %v437_v61, %v436_v60 }
  0x23   : > { %1698 = vmatpush3.bf16.msra.mxu1 %v1697_v25  ;;  %1668 = vmatprep.subr.bf16.mxu0 %v1667_v26  ;;  %v469_v1 = vld [vmem:[%s2514_s1 + $0x3a8] sm:$0xff]  ;;  %v291_v2 = vld [vmem:[%s2069_s14 + $0x58] sm:$0xff]  ;;  %v1741_v3 = vpack.c.bf16 %v451_v57, %v450_v56  ;;  %v420_v4 = vld [vmem:[%s2514_s1 + $0x220] sm:$0xff] }
  0x24   : > { %1700 = vmatprep.subr.bf16.mxu1 %v1699_v30  ;;  %v421_v5 = vld [vmem:[%s2514_s1 + $0x228] sm:$0xff]  ;;  %v299_v6 = vld [vmem:[%s2069_s14 + $0x98] sm:$0xff]  ;;  %v452_v8 = vld [vmem:[%s2514_s1 + $0x320] sm:$0xff]  ;;  %v1743_v11 = vpack.c.bf16 %v469_v1, %v468_v0 }
  0x25   : > { %v453_v9 = vld [vmem:[%s2514_s1 + $0x328] sm:$0xff]  ;;  %v438_v12 = vld [vmem:[%s2514_s1 + $0x2b0] sm:$0xff]  ;;  %v439_v13 = vld [vmem:[%s2514_s1 + $0x2b8] sm:$0xff]  ;;  %v1713_v15 = vpack.c.bf16 %v421_v5, %v420_v4 }
  0x26   : > { %1670 = vmatpush3.bf16.msra.mxu0 %v1669_v36  ;;  %v301_v10 = vld [vmem:[%s2069_s14 + $0xa8] sm:$0xff]  ;;  %v298_v14 = vld [vmem:[%s2069_s14 + $0x90] sm:$0xff]  ;;  %v471_v17 = vld [vmem:[%s2514_s1 + $0x3b8] sm:$0xff]  ;;  %v1745_v19 = vpack.c.bf16 %v453_v9, %v452_v8  ;;  %v1715_v23 = vpack.c.bf16 %v439_v13, %v438_v12 }
  0x27   : > { %1702 = vmatpush3.bf16.msra.mxu1 %v1701_v37  ;;  %1704 = vmatprep.subr.bf16.mxu0 %v1703_v38  ;;  %v470_v16 = vld [vmem:[%s2514_s1 + $0x3b0] sm:$0xff]  ;;  %v300_v18 = vld [vmem:[%s2069_s14 + $0xa0] sm:$0xff]  ;;  %v423_v21 = vld [vmem:[%s2514_s1 + $0x238] sm:$0xff] }
  0x28   : > { %1736 = vmatprep.subr.bf16.mxu1 %v1735_v41  ;;  %v422_v20 = vld [vmem:[%s2514_s1 + $0x230] sm:$0xff]  ;;  %v308_v22 = vld [vmem:[%s2069_s14 + $0xe0] sm:$0xff]  ;;  %v455_v25 = vld [vmem:[%s2514_s1 + $0x338] sm:$0xff]  ;;  %v1747_v27 = vpack.c.bf16 %v471_v17, %v470_v16 }
  0x29   : > { %568 = vmatmul.mubr.f32.vlgmr.msra.gmra.mrb[0].mxu0 %v280_v46  ;;  %v454_v24 = vld [vmem:[%s2514_s1 + $0x330] sm:$0xff]  ;;  %v440_v28 = vld [vmem:[%s2514_s1 + $0x2c0] sm:$0xff]  ;;  %v441_v29 = vld [vmem:[%s2514_s1 + $0x2c8] sm:$0xff]  ;;  %v1717_v31 = vpack.c.bf16 %v423_v21, %v422_v20 }
  0x2a   : > { %673 = vmatmul.mubr.f32.vlgmr.msra.gmra.mrb[0].mxu1 %v282_v50  ;;  %1706 = vmatpush3.bf16.msra.mxu0 %v1705_v47  ;;  %v310_v26 = vld [vmem:[%s2069_s14 + $0xf0] sm:$0xff]  ;;  %v307_v30 = vld [vmem:[%s2069_s14 + $0xd8] sm:$0xff]  ;;  %v472_v32 = vld [vmem:[%s2514_s1 + $0x3c0] sm:$0xff]  ;;  %v1749_v35 = vpack.c.bf16 %v455_v25, %v454_v24  ;;  %v1719_v39 = vpack.c.bf16 %v441_v29, %v440_v28 }
  0x2b   : > { %1738 = vmatpush3.bf16.msra.mxu1 %v1737_v51  ;;  %572 = vmatprep.mubr.f32.mxu0 %v290_v54  ;;  %v473_v33 = vld [vmem:[%s2514_s1 + $0x3c8] sm:$0xff]  ;;  %v424_v36 = vld [vmem:[%s2514_s1 + $0x240] sm:$0xff]  ;;  %v319_v42 = vld [vmem:[%s2069_s14 + $0x138] sm:$0xff] }
  0x2c   : > { %677 = vmatprep.mubr.f32.mxu1 %v292_v58  ;;  %1708 = vmatprep.subr.bf16.mxu0 %v1707_v55  ;;  %v309_v34 = vld [vmem:[%s2069_s14 + $0xe8] sm:$0xff]  ;;  %v456_v40 = vld [vmem:[%s2514_s1 + $0x340] sm:$0xff]  ;;  %v1751_v43 = vpack.c.bf16 %v473_v33, %v472_v32  ;;  %v442_v44 = vld [vmem:[%s2514_s1 + $0x2d0] sm:$0xff] }
  0x2d   : > { %573 = vmatmul.mubr.f32.gmra.mrb[2].mxu0 %v289_v62  ;;  %1740 = vmatprep.subr.bf16.mxu1 %v1739_v59  ;;  %v425_v37 = vld [vmem:[%s2514_s1 + $0x248] sm:$0xff]  ;;  %v443_v45 = vld [vmem:[%s2514_s1 + $0x2d8] sm:$0xff]  ;;  %v316_v46 = vld [vmem:[%s2069_s14 + $0x120] sm:$0xff] }
  0x2e   : > { %678 = vmatmul.mubr.f32.gmra.mrb[2].mxu1 %v291_v2  ;;  %1710 = vmatpush3.bf16.msra.mxu0 %v1709_v63  ;;  %v317_v38 = vld [vmem:[%s2069_s14 + $0x128] sm:$0xff]  ;;  %v1721_v47 = vpack.c.bf16 %v425_v37, %v424_v36  ;;  %v474_v48 = vld [vmem:[%s2514_s1 + $0x3d0] sm:$0xff]  ;;  %v475_v49 = vld [vmem:[%s2514_s1 + $0x3d8] sm:$0xff]  ;;  %v1723_v55 = vpack.c.bf16 %v443_v45, %v442_v44 }
  0x2f   : > { %1742 = vmatpush3.bf16.msra.mxu1 %v1741_v3  ;;  %577 = vmatprep.mubr.f32.mxu0 %v299_v6  ;;  %v457_v41 = vld [vmem:[%s2514_s1 + $0x348] sm:$0xff]  ;;  %v318_v50 = vld [vmem:[%s2069_s14 + $0x130] sm:$0xff]  ;;  %v427_v53 = vld [vmem:[%s2514_s1 + $0x258] sm:$0xff]  ;;  %v1755_v59 = vpack.c.bf16 %v475_v49, %v474_v48 }
  0x30   : > { %682 = vmatprep.mubr.f32.mxu1 %v301_v10  ;;  %1712 = vmatprep.subr.bf16.mxu0 %v1711_v7  ;;  %v1753_v51 = vpack.c.bf16 %v457_v41, %v456_v40  ;;  %v426_v52 = vld [vmem:[%s2514_s1 + $0x250] sm:$0xff]  ;;  %v459_v57 = vld [vmem:[%s2514_s1 + $0x358] sm:$0xff]  ;;  %v328_v58 = vld [vmem:[%s2069_s14 + $0x180] sm:$0xff] }
  0x31   : > { %578 = vmatmul.mubr.f32.gmra.mrb[4].mxu0 %v298_v14  ;;  %1744 = vmatprep.subr.bf16.mxu1 %v1743_v11  ;;  %v326_v54 = vld [vmem:[%s2069_s14 + $0x170] sm:$0xff]  ;;  %v444_v60 = vld [vmem:[%s2514_s1 + $0x2e0] sm:$0xff]  ;;  %v445_v61 = vld [vmem:[%s2514_s1 + $0x2e8] sm:$0xff]  ;;  %v1725_v63 = vpack.c.bf16 %v427_v53, %v426_v52 }
  0x32   : > { %683 = vmatmul.mubr.f32.gmra.mrb[4].mxu1 %v300_v18  ;;  %1714 = vmatpush3.bf16.msra.mxu0 %v1713_v15  ;;  %v458_v56 = vld [vmem:[%s2514_s1 + $0x350] sm:$0xff]  ;;  %v325_v62 = vld [vmem:[%s2069_s14 + $0x168] sm:$0xff]  ;;  %v476_v0 = vld [vmem:[%s2514_s1 + $0x3e0] sm:$0xff]  ;;  %v1727_v7 = vpack.c.bf16 %v445_v61, %v444_v60 }
  0x33   : > { %1746 = vmatpush3.bf16.msra.mxu1 %v1745_v19  ;;  %582 = vmatprep.mubr.f32.mxu0 %v308_v22  ;;  %v477_v1 = vld [vmem:[%s2514_s1 + $0x3e8] sm:$0xff]  ;;  %v327_v2 = vld [vmem:[%s2069_s14 + $0x178] sm:$0xff]  ;;  %v1757_v3 = vpack.c.bf16 %v459_v57, %v458_v56  ;;  %v428_v4 = vld [vmem:[%s2514_s1 + $0x260] sm:$0xff] }
  0x34   : > { %687 = vmatprep.mubr.f32.mxu1 %v310_v26  ;;  %1716 = vmatprep.subr.bf16.mxu0 %v1715_v23  ;;  %v429_v5 = vld [vmem:[%s2514_s1 + $0x268] sm:$0xff]  ;;  %v335_v6 = vld [vmem:[%s2069_s14 + $0x1b8] sm:$0xff]  ;;  %v460_v8 = vld [vmem:[%s2514_s1 + $0x360] sm:$0xff]  ;;  %v1759_v11 = vpack.c.bf16 %v477_v1, %v476_v0 }
  0x35   : > { %583 = vmatmul.mubr.f32.gmra.mrb[6].mxu0 %v307_v30  ;;  %1748 = vmatprep.subr.bf16.mxu1 %v1747_v27  ;;  %v461_v9 = vld [vmem:[%s2514_s1 + $0x368] sm:$0xff]  ;;  %v446_v12 = vld [vmem:[%s2514_s1 + $0x2f0] sm:$0xff]  ;;  %v447_v13 = vld [vmem:[%s2514_s1 + $0x2f8] sm:$0xff]  ;;  %v1729_v15 = vpack.c.bf16 %v429_v5, %v428_v4 }
  0x36   : > { %688 = vmatmul.mubr.f32.gmra.mrb[6].mxu1 %v309_v34  ;;  %1718 = vmatpush3.bf16.msra.mxu0 %v1717_v31  ;;  %v337_v10 = vld [vmem:[%s2069_s14 + $0x1c8] sm:$0xff]  ;;  %v334_v14 = vld [vmem:[%s2069_s14 + $0x1b0] sm:$0xff]  ;;  %v479_v17 = vld [vmem:[%s2514_s1 + $0x3f8] sm:$0xff]  ;;  %v1761_v19 = vpack.c.bf16 %v461_v9, %v460_v8  ;;  %v1731_v23 = vpack.c.bf16 %v447_v13, %v446_v12 }
  0x37   : > { %1750 = vmatpush3.bf16.msra.mxu1 %v1749_v35  ;;  %587 = vmatprep.mubr.f32.mxu0 %v317_v38  ;;  %v478_v16 = vld [vmem:[%s2514_s1 + $0x3f0] sm:$0xff]  ;;  %v336_v18 = vld [vmem:[%s2069_s14 + $0x1c0] sm:$0xff]  ;;  %v431_v21 = vld [vmem:[%s2514_s1 + $0x278] sm:$0xff] }
  0x38   : > { %692 = vmatprep.mubr.f32.mxu1 %v319_v42  ;;  %1720 = vmatprep.subr.bf16.mxu0 %v1719_v39  ;;  %v430_v20 = vld [vmem:[%s2514_s1 + $0x270] sm:$0xff]  ;;  %v344_v22 = vld [vmem:[%s2069_s14 + $0x200] sm:$0xff]  ;;  %v463_v25 = vld [vmem:[%s2514_s1 + $0x378] sm:$0xff]  ;;  %v1763_v27 = vpack.c.bf16 %v479_v17, %v478_v16 }
  0x39   : > { %588 = vmatmul.mubr.f32.gmra.mrb[8].mxu0 %v316_v46  ;;  %1752 = vmatprep.subr.bf16.mxu1 %v1751_v43  ;;  %v462_v24 = vld [vmem:[%s2514_s1 + $0x370] sm:$0xff]  ;;  %v480_v28 = vld [vmem:[%s2514_s1 + $0x400] sm:$0xff]  ;;  %v481_v29 = vld [vmem:[%s2514_s1 + $0x408] sm:$0xff]  ;;  %v1733_v31 = vpack.c.bf16 %v431_v21, %v430_v20 }
  0x3a   : > { %693 = vmatmul.mubr.f32.gmra.mrb[8].mxu1 %v318_v50  ;;  %1722 = vmatpush3.bf16.msra.mxu0 %v1721_v47  ;;  %v346_v26 = vld [vmem:[%s2069_s14 + $0x210] sm:$0xff]  ;;  %v343_v30 = vld [vmem:[%s2069_s14 + $0x1f8] sm:$0xff]  ;;  %v1036_v32 = vld [vmem:[%s2517_s4] sm:$0xff]  ;;  %v1765_v35 = vpack.c.bf16 %v463_v25, %v462_v24  ;;  %v1767_v37 = vpack.c.bf16 %v481_v29, %v480_v28 }
  0x3b   : > { %1754 = vmatpush3.bf16.msra.mxu1 %v1753_v51  ;;  %592 = vmatprep.mubr.f32.mxu0 %v326_v54  ;;  %v1037_v33 = vld [vmem:[%s2517_s4 + $0x8] sm:$0xff]  ;;  %v287_v38 = vld [vmem:[%s2069_s14 + $0x38] sm:$0xff]  ;;  %v482_v40 = vld [vmem:[%s2514_s1 + $0x410] sm:$0xff] }
  0x3c   : > { %697 = vmatprep.mubr.f32.mxu1 %v328_v58  ;;  %1724 = vmatprep.subr.bf16.mxu0 %v1723_v55  ;;  %v345_v34 = vld [vmem:[%s2069_s14 + $0x208] sm:$0xff]  ;;  %v1799_v39 = vpack.c.bf16 %v1037_v33, %v1036_v32  ;;  %v483_v41 = vld [vmem:[%s2514_s1 + $0x418] sm:$0xff]  ;;  %v284_v42 = vld [vmem:[%s2069_s14 + $0x20] sm:$0xff] }
  0x3d   : > { %593 = vmatmul.mubr.f32.gmra.mrb[10].mxu0 %v325_v62  ;;  %1756 = vmatprep.subr.bf16.mxu1 %v1755_v59  ;;  %v285_v36 = vld [vmem:[%s2069_s14 + $0x28] sm:$0xff]  ;;  %v1038_v43 = vld [vmem:[%s2517_s4 + $0x10] sm:$0xff]  ;;  %v1039_v44 = vld [vmem:[%s2517_s4 + $0x18] sm:$0xff]  ;;  %v1771_v48 = vpack.c.bf16 %v483_v41, %v482_v40 }
  0x3e   : > { %698 = vmatmul.mubr.f32.gmra.mrb[10].mxu1 %v327_v2  ;;  %1726 = vmatpush3.bf16.msra.mxu0 %v1725_v63  ;;  %v286_v45 = vld [vmem:[%s2069_s14 + $0x30] sm:$0xff]  ;;  %v296_v47 = vld [vmem:[%s2069_s14 + $0x80] sm:$0xff]  ;;  %v1803_v49 = vpack.c.bf16 %v1039_v44, %v1038_v43  ;;  %v485_v51 = vld [vmem:[%s2514_s1 + $0x428] sm:$0xff] }
  0x3f   : > { %1758 = vmatpush3.bf16.msra.mxu1 %v1757_v3  ;;  %597 = vmatprep.mubr.f32.mxu0 %v335_v6  ;;  %v294_v46 = vld [vmem:[%s2069_s14 + $0x70] sm:$0xff]  ;;  %v484_v50 = vld [vmem:[%s2514_s1 + $0x420] sm:$0xff]  ;;  %v293_v52 = vld [vmem:[%s2069_s14 + $0x68] sm:$0xff] }
  0x40   : > { %702 = vmatprep.mubr.f32.mxu1 %v337_v10  ;;  %1728 = vmatprep.subr.bf16.mxu0 %v1727_v7  ;;  %v1040_v53 = vld [vmem:[%s2517_s4 + $0x20] sm:$0xff]  ;;  %v1041_v54 = vld [vmem:[%s2517_s4 + $0x28] sm:$0xff]  ;;  %v295_v55 = vld [vmem:[%s2069_s14 + $0x78] sm:$0xff]  ;;  %v1775_v58 = vpack.c.bf16 %v485_v51, %v484_v50 }
  0x41   : > { %598 = vmatmul.mubr.f32.gmra.mrb[12].mxu0 %v334_v14  ;;  %1760 = vmatprep.subr.bf16.mxu1 %v1759_v11  ;;  %v303_v56 = vld [vmem:[%s2069_s14 + $0xb8] sm:$0xff]  ;;  %v305_v57 = vld [vmem:[%s2069_s14 + $0xc8] sm:$0xff]  ;;  %v1807_v59 = vpack.c.bf16 %v1041_v54, %v1040_v53  ;;  %v486_v60 = vld [vmem:[%s2514_s1 + $0x430] sm:$0xff] }
  0x42   : > { %703 = vmatmul.mubr.f32.gmra.mrb[12].mxu1 %v336_v18  ;;  %1730 = vmatpush3.bf16.msra.mxu0 %v1729_v15  ;;  %v487_v61 = vld [vmem:[%s2514_s1 + $0x438] sm:$0xff]  ;;  %v302_v62 = vld [vmem:[%s2069_s14 + $0xb0] sm:$0xff]  ;;  %v304_v1 = vld [vmem:[%s2069_s14 + $0xc0] sm:$0xff] }
  0x43   : > { %1762 = vmatpush3.bf16.msra.mxu1 %v1761_v19  ;;  %602 = vmatprep.mubr.f32.mxu0 %v344_v22  ;;  %v1042_v63 = vld [vmem:[%s2517_s4 + $0x30] sm:$0xff]  ;;  %v1043_v0 = vld [vmem:[%s2517_s4 + $0x38] sm:$0xff]  ;;  %v312_v2 = vld [vmem:[%s2069_s14 + $0x100] sm:$0xff]  ;;  %v1779_v4 = vpack.c.bf16 %v487_v61, %v486_v60 }
  0x44   : > { %707 = vmatprep.mubr.f32.mxu1 %v346_v26  ;;  %1732 = vmatprep.subr.bf16.mxu0 %v1731_v23  ;;  %v314_v3 = vld [vmem:[%s2069_s14 + $0x110] sm:$0xff]  ;;  %v1811_v5 = vpack.c.bf16 %v1043_v0, %v1042_v63  ;;  %v488_v6 = vld [vmem:[%s2514_s1 + $0x440] sm:$0xff]  ;;  %v489_v7 = vld [vmem:[%s2514_s1 + $0x448] sm:$0xff] }
  0x45   : > { %603 = vmatmul.mubr.f32.gmra.mrb[14].mxu0 %v343_v30  ;;  %1764 = vmatprep.subr.bf16.mxu1 %v1763_v27  ;;  %v311_v8 = vld [vmem:[%s2069_s14 + $0xf8] sm:$0xff]  ;;  %v1044_v9 = vld [vmem:[%s2517_s4 + $0x40] sm:$0xff]  ;;  %v1045_v10 = vld [vmem:[%s2517_s4 + $0x48] sm:$0xff]  ;;  %v1783_v14 = vpack.c.bf16 %v489_v7, %v488_v6 }
  0x46   : > { %708 = vmatmul.mubr.f32.gmra.mrb[14].mxu1 %v345_v34  ;;  %1734 = vmatpush3.bf16.msra.mxu0 %v1733_v31  ;;  %v313_v11 = vld [vmem:[%s2069_s14 + $0x108] sm:$0xff]  ;;  %v323_v13 = vld [vmem:[%s2069_s14 + $0x158] sm:$0xff]  ;;  %v1815_v15 = vpack.c.bf16 %v1045_v10, %v1044_v9  ;;  %v490_v16 = vld [vmem:[%s2514_s1 + $0x450] sm:$0xff] }
  0x47   : > { %1766 = vmatpush3.bf16.msra.mxu1 %v1765_v35  ;;  %777 = vmatprep.mubr.f32.mxu0 %v285_v36  ;;  %v321_v12 = vld [vmem:[%s2069_s14 + $0x148] sm:$0xff]  ;;  %v491_v17 = vld [vmem:[%s2514_s1 + $0x458] sm:$0xff]  ;;  %v320_v18 = vld [vmem:[%s2069_s14 + $0x140] sm:$0xff] }
  0x48   : > { %882 = vmatprep.mubr.f32.mxu1 %v287_v38  ;;  %1768 = vmatprep.subr.bf16.mxu1 %v1767_v37  ;;  %v1046_v19 = vld [vmem:[%s2517_s4 + $0x50] sm:$0xff]  ;;  %v1047_v20 = vld [vmem:[%s2517_s4 + $0x58] sm:$0xff]  ;;  %v332_v23 = vld [vmem:[%s2069_s14 + $0x1a0] sm:$0xff]  ;;  %v1787_v24 = vpack.c.bf16 %v491_v17, %v490_v16 }
  0x49   : > { %778 = vmatmul.mubr.f32.vlgmr.msra.gmra.mrb[16].mxu0 %v284_v42  ;;  %1800 = vmatprep.subr.bf16.mxu0 %v1799_v39  ;;  %v322_v21 = vld [vmem:[%s2069_s14 + $0x150] sm:$0xff]  ;;  %v1819_v25 = vpack.c.bf16 %v1047_v20, %v1046_v19  ;;  %v492_v26 = vld [vmem:[%s2514_s1 + $0x460] sm:$0xff]  ;;  %v493_v27 = vld [vmem:[%s2514_s1 + $0x468] sm:$0xff] }
  0x4a   : > { %883 = vmatmul.mubr.f32.vlgmr.msra.gmra.mrb[16].mxu1 %v286_v45  ;;  %782 = vmatprep.mubr.f32.mxu0 %v294_v46  ;;  %v330_v22 = vld [vmem:[%s2069_s14 + $0x190] sm:$0xff]  ;;  %v329_v28 = vld [vmem:[%s2069_s14 + $0x188] sm:$0xff]  ;;  %v1048_v29 = vld [vmem:[%s2517_s4 + $0x60] sm:$0xff]  ;;  %v1791_v34 = vpack.c.bf16 %v493_v27, %v492_v26 }
  0x4b   : > { %1770 = vmatpush3.bf16.msra.mxu1 %v1767_v37  ;;  %887 = vmatprep.mubr.f32.mxu1 %v296_v47  ;;  %v1049_v30 = vld [vmem:[%s2517_s4 + $0x68] sm:$0xff]  ;;  %v331_v31 = vld [vmem:[%s2069_s14 + $0x198] sm:$0xff]  ;;  %v494_v36 = vld [vmem:[%s2514_s1 + $0x470] sm:$0xff] }
  0x4c   : > { %1802 = vmatpush3.bf16.msra.mxu0 %v1799_v39  ;;  %1772 = vmatprep.subr.bf16.mxu1 %v1771_v48  ;;  %v339_v32 = vld [vmem:[%s2069_s14 + $0x1d8] sm:$0xff]  ;;  %v341_v33 = vld [vmem:[%s2069_s14 + $0x1e8] sm:$0xff]  ;;  %v1823_v35 = vpack.c.bf16 %v1049_v30, %v1048_v29  ;;  %v338_v38 = vld [vmem:[%s2069_s14 + $0x1d0] sm:$0xff] }
  0x4d   : > { %783 = vmatmul.mubr.f32.gmra.mrb[18].mxu0 %v293_v52  ;;  %1804 = vmatprep.subr.bf16.mxu0 %v1803_v49  ;;  %v495_v37 = vld [vmem:[%s2514_s1 + $0x478] sm:$0xff]  ;;  %v1050_v39 = vld [vmem:[%s2517_s4 + $0x70] sm:$0xff]  ;;  %v340_v41 = vld [vmem:[%s2069_s14 + $0x1e0] sm:$0xff] }
  0x4e   : > { %888 = vmatmul.mubr.f32.gmra.mrb[18].mxu1 %v295_v55  ;;  %787 = vmatprep.mubr.f32.mxu0 %v303_v56  ;;  %v1051_v40 = vld [vmem:[%s2517_s4 + $0x78] sm:$0xff]  ;;  %v348_v42 = vld [vmem:[%s2069_s14 + $0x220] sm:$0xff]  ;;  %v350_v43 = vld [vmem:[%s2069_s14 + $0x230] sm:$0xff]  ;;  %v1795_v44 = vpack.c.bf16 %v495_v37, %v494_v36 }
  0x4f   : > { %1774 = vmatpush3.bf16.msra.mxu1 %v1771_v48  ;;  %892 = vmatprep.mubr.f32.mxu1 %v305_v57  ;;  %v1827_v45 = vpack.c.bf16 %v1051_v40, %v1050_v39  ;;  %v347_v46 = vld [vmem:[%s2069_s14 + $0x218] sm:$0xff]  ;;  %v349_v47 = vld [vmem:[%s2069_s14 + $0x228] sm:$0xff]  ;;  %v1028_v48 = vld [vmem:[%s2469_s7] sm:$0xff] }
  0x50   : > { %1806 = vmatpush3.bf16.msra.mxu0 %v1803_v49  ;;  %1776 = vmatprep.subr.bf16.mxu1 %v1775_v58  ;;  %v288_v49 = vld [vmem:[%s2069_s14 + $0x40] sm:$0xff]  ;;  %v297_v50 = vld [vmem:[%s2069_s14 + $0x88] sm:$0xff]  ;;  %v306_v52 = vld [vmem:[%s2069_s14 + $0xd0] sm:$0xff] }
  0x51   : > { %788 = vmatmul.mubr.f32.gmra.mrb[20].mxu0 %v302_v62  ;;  %1808 = vmatprep.subr.bf16.mxu0 %v1807_v59  ;;  %v1029_v51 = vld [vmem:[%s2469_s7 + $0x8] sm:$0xff]  ;;  %v1030_v53 = vld [vmem:[%s2469_s7 + $0x10] sm:$0xff]  ;;  %v315_v54 = vld [vmem:[%s2069_s14 + $0x118] sm:$0xff] }
  0x52   : > { %893 = vmatmul.mubr.f32.gmra.mrb[20].mxu1 %v304_v1  ;;  %792 = vmatprep.mubr.f32.mxu0 %v312_v2  ;;  %v1031_v55 = vld [vmem:[%s2469_s7 + $0x18] sm:$0xff]  ;;  %v324_v56 = vld [vmem:[%s2069_s14 + $0x160] sm:$0xff]  ;;  %v342_v60 = vld [vmem:[%s2069_s14 + $0x1f0] sm:$0xff] }
  0x53   : > { %1778 = vmatpush3.bf16.msra.mxu1 %v1775_v58  ;;  %897 = vmatprep.mubr.f32.mxu1 %v314_v3  ;;  %v1032_v57 = vld [vmem:[%s2469_s7 + $0x20] sm:$0xff]  ;;  %v333_v58 = vld [vmem:[%s2069_s14 + $0x1a8] sm:$0xff]  ;;  %v1034_v61 = vld [vmem:[%s2469_s7 + $0x30] sm:$0xff] }
  0x54   : > { %1810 = vmatpush3.bf16.msra.mxu0 %v1807_v59  ;;  %1780 = vmatprep.subr.bf16.mxu1 %v1779_v4  ;;  %v1033_v59 = vld [vmem:[%s2469_s7 + $0x28] sm:$0xff]  ;;  %v351_v62 = vld [vmem:[%s2069_s14 + $0x238] sm:$0xff]  ;;  %v1275_v2 = vld [vmem:[%s2515_s2] ss:$0 sm:$0xff] }
  0x55   : > { %793 = vmatmul.mubr.f32.gmra.mrb[22].mxu0 %v311_v8  ;;  %1812 = vmatprep.subr.bf16.mxu0 %v1811_v5  ;;  %v1035_v63 = vld [vmem:[%s2469_s7 + $0x38] sm:$0xff] }
  0x56   : > { %898 = vmatmul.mubr.f32.gmra.mrb[22].mxu1 %v313_v11  ;;  %797 = vmatprep.mubr.f32.mxu0 %v321_v12 }
  0x57   : > { %1782 = vmatpush3.bf16.msra.mxu1 %v1779_v4  ;;  %902 = vmatprep.mubr.f32.mxu1 %v323_v13 }
  0x58   : > { %1814 = vmatpush3.bf16.msra.mxu0 %v1811_v5  ;;  %1784 = vmatprep.subr.bf16.mxu1 %v1783_v14 }
  0x59   : > { %798 = vmatmul.mubr.f32.gmra.mrb[24].mxu0 %v320_v18  ;;  %1816 = vmatprep.subr.bf16.mxu0 %v1815_v15 }
  0x5a   : > { %903 = vmatmul.mubr.f32.gmra.mrb[24].mxu1 %v322_v21  ;;  %802 = vmatprep.mubr.f32.mxu0 %v330_v22 }
  0x5b   : > { %1786 = vmatpush3.bf16.msra.mxu1 %v1783_v14  ;;  %907 = vmatprep.mubr.f32.mxu1 %v332_v23 }
  0x5c   : > { %1818 = vmatpush3.bf16.msra.mxu0 %v1815_v15  ;;  %1788 = vmatprep.subr.bf16.mxu1 %v1787_v24 }
  0x5d   : > { %803 = vmatmul.mubr.f32.gmra.mrb[26].mxu0 %v329_v28  ;;  %1820 = vmatprep.subr.bf16.mxu0 %v1819_v25 }
  0x5e   : > { %908 = vmatmul.mubr.f32.gmra.mrb[26].mxu1 %v331_v31  ;;  %807 = vmatprep.mubr.f32.mxu0 %v339_v32 }
  0x5f   : > { %1790 = vmatpush3.bf16.msra.mxu1 %v1787_v24  ;;  %912 = vmatprep.mubr.f32.mxu1 %v341_v33 }
  0x60   : > { %1822 = vmatpush3.bf16.msra.mxu0 %v1819_v25  ;;  %1792 = vmatprep.subr.bf16.mxu1 %v1791_v34 }
  0x61   : > { %808 = vmatmul.mubr.f32.gmra.mrb[28].mxu0 %v338_v38  ;;  %1824 = vmatprep.subr.bf16.mxu0 %v1823_v35 }
  0x62   : > { %913 = vmatmul.mubr.f32.gmra.mrb[28].mxu1 %v340_v41  ;;  %812 = vmatprep.mubr.f32.mxu0 %v348_v42 }
  0x63   : > { %1794 = vmatpush3.bf16.msra.mxu1 %v1791_v34  ;;  %917 = vmatprep.mubr.f32.mxu1 %v350_v43 }
  0x64   : > { %1826 = vmatpush3.bf16.msra.mxu0 %v1823_v35  ;;  %1796 = vmatprep.subr.bf16.mxu1 %v1795_v44 }
  0x65   : > { %813 = vmatmul.mubr.f32.gmra.mrb[30].mxu0 %v347_v46  ;;  %1828 = vmatprep.subr.bf16.mxu0 %v1827_v45 }
  0x66   : > { %918 = vmatmul.mubr.f32.gmra.mrb[30].mxu1 %v349_v47  ;;  %1627 = vmatprep.mubr.f32.mxu0 %v1028_v48 }
  0x67   : > { %1798 = vmatpush3.bf16.msra.mxu1 %v1795_v44  ;;  %1583 = vmatprep.mubr.f32.mxu1 %v288_v49 }
  0x68   : > { %1830 = vmatpush3.bf16.msra.mxu0 %v1827_v45 }
  0x6a   : > { %1584 = vmatmul.mubr.f32.vlgmr.msra.gmra.mrb[32].mxu1 %v297_v50 }
  0x6b   : > { %1628 = vmatmul.mubr.f32.vlgmr.msra.gmra.mrb[32].mxu0 %v1029_v51  ;;  %1586 = vmatprep.mubr.f32.mxu1 %v306_v52 }
  0x6c   : > { %1630 = vmatprep.mubr.f32.mxu0 %v1030_v53 }
  0x6e   : > { %1587 = vmatmul.mubr.f32.gmra.mrb[34].mxu1 %v315_v54 }
  0x6f   : > { %1631 = vmatmul.mubr.f32.gmra.mrb[34].mxu0 %v1031_v55  ;;  %1589 = vmatprep.mubr.f32.mxu1 %v324_v56 }
  0x70   : > { %1633 = vmatprep.mubr.f32.mxu0 %v1032_v57 }
  0x72   : > { %1590 = vmatmul.mubr.f32.gmra.mrb[36].mxu1 %v333_v58 }
  0x73   : > { %1634 = vmatmul.mubr.f32.gmra.mrb[36].mxu0 %v1033_v59  ;;  %1592 = vmatprep.mubr.f32.mxu1 %v342_v60 }
  0x74   : > { %1636 = vmatprep.mubr.f32.mxu0 %v1034_v61 }
  0x76   : > { %1593 = vmatmul.mubr.f32.gmra.mrb[38].mxu1 %v351_v62 }
  0x77   : > { %1637 = vmatmul.mubr.f32.gmra.mrb[38].mxu0 %v1035_v63 }
  0xfc   : > { %v1311_v0 = vpop.f32.mrb[0].mxu0 }
  0xfd   : > { %v1367_v1 = vpop.f32.mrb[0].mxu1  ;;  %v1312_v3 = vpop.f32.mrb[1].mxu0 }
  0xfe   : > { %v1313_v4 = vadd.f32 %v1312_v3, %v1311_v0  ;;  %v1368_v5 = vpop.f32.mrb[1].mxu1 }
  0xff   : > { %v1369_v6 = vadd.f32 %v1368_v5, %v1367_v1 }
 0x100   : > { %v570_v7 = vadd.f32 %v1313_v4, %v1275_v2  ;;  %v1314_v8 = vpop.f32.mrb[2].mxu0 }
 0x101   : > { %v1370_v9 = vpop.f32.mrb[2].mxu1  ;;  %v1315_v10 = vpop.f32.mrb[3].mxu0 }
 0x102   : > { %v675_v11 = vadd.f32 %v1369_v6, %v570_v7  ;;  %v1316_v12 = vadd.f32 %v1315_v10, %v1314_v8  ;;  %v1371_v13 = vpop.f32.mrb[3].mxu1 }
 0x103   : > { %v1372_v14 = vadd.f32 %v1371_v13, %v1370_v9 }
 0x104   : > { %v575_v15 = vadd.f32 %v1316_v12, %v1275_v2  ;;  %v1317_v16 = vpop.f32.mrb[4].mxu0 }
 0x105   : > { %v1373_v17 = vpop.f32.mrb[4].mxu1  ;;  %v1318_v18 = vpop.f32.mrb[5].mxu0 }
 0x106   : > { %v680_v19 = vadd.f32 %v1372_v14, %v575_v15  ;;  %v1319_v20 = vadd.f32 %v1318_v18, %v1317_v16  ;;  %v1374_v21 = vpop.f32.mrb[5].mxu1 }
 0x107   : > { %v1375_v22 = vadd.f32 %v1374_v21, %v1373_v17 }
 0x108   : > { %v580_v23 = vadd.f32 %v1319_v20, %v1275_v2  ;;  %v1320_v24 = vpop.f32.mrb[6].mxu0 }
 0x109   : > { %v1376_v25 = vpop.f32.mrb[6].mxu1  ;;  %v1321_v26 = vpop.f32.mrb[7].mxu0 }
 0x10a   : > { %v685_v27 = vadd.f32 %v1375_v22, %v580_v23  ;;  %v1322_v28 = vadd.f32 %v1321_v26, %v1320_v24  ;;  %v1377_v29 = vpop.f32.mrb[7].mxu1 }
 0x10b   : > { %v1378_v30 = vadd.f32 %v1377_v29, %v1376_v25 }
 0x10c   : > { %v585_v31 = vadd.f32 %v1322_v28, %v1275_v2  ;;  %v1323_v32 = vpop.f32.mrb[8].mxu0 }
 0x10d   : > { %v1379_v33 = vpop.f32.mrb[8].mxu1  ;;  %v1324_v34 = vpop.f32.mrb[9].mxu0 }
 0x10e   : > { %v690_v35 = vadd.f32 %v1378_v30, %v585_v31  ;;  %v1325_v36 = vadd.f32 %v1324_v34, %v1323_v32  ;;  %v1380_v37 = vpop.f32.mrb[9].mxu1 }
 0x10f   : > { %v1381_v38 = vadd.f32 %v1380_v37, %v1379_v33 }
 0x110   : > { %v590_v39 = vadd.f32 %v1325_v36, %v1275_v2  ;;  %v1326_v40 = vpop.f32.mrb[10].mxu0 }
 0x111   : > { %v1382_v41 = vpop.f32.mrb[10].mxu1  ;;  %v1327_v42 = vpop.f32.mrb[11].mxu0 }
 0x112   : > { %v695_v43 = vadd.f32 %v1381_v38, %v590_v39  ;;  %v1328_v44 = vadd.f32 %v1327_v42, %v1326_v40  ;;  %v1383_v45 = vpop.f32.mrb[11].mxu1 }
 0x113   : > { %v1384_v46 = vadd.f32 %v1383_v45, %v1382_v41 }
 0x114   : > { %v595_v47 = vadd.f32 %v1328_v44, %v1275_v2  ;;  %v1329_v48 = vpop.f32.mrb[12].mxu0 }
 0x115   : > { %v1385_v49 = vpop.f32.mrb[12].mxu1  ;;  %v1330_v50 = vpop.f32.mrb[13].mxu0 }
 0x116   : > { %v700_v51 = vadd.f32 %v1384_v46, %v595_v47  ;;  %v1331_v52 = vadd.f32 %v1330_v50, %v1329_v48  ;;  %v1386_v53 = vpop.f32.mrb[13].mxu1 }
 0x117   : > { %v1387_v54 = vadd.f32 %v1386_v53, %v1385_v49 }
 0x118   : > { %v600_v55 = vadd.f32 %v1331_v52, %v1275_v2  ;;  %v1332_v56 = vpop.f32.mrb[14].mxu0 }
 0x119   : > { %v1388_v57 = vpop.f32.mrb[14].mxu1  ;;  %v1333_v58 = vpop.f32.mrb[15].mxu0 }
 0x11a   : > { %v705_v59 = vadd.f32 %v1387_v54, %v600_v55  ;;  %v1334_v60 = vadd.f32 %v1333_v58, %v1332_v56  ;;  %v1389_v61 = vpop.f32.mrb[15].mxu1 }
 0x11b   : > { %v1390_v62 = vadd.f32 %v1389_v61, %v1388_v57 }
 0x11c   : > { %v605_v63 = vadd.f32 %v1334_v60, %v1275_v2  ;;  %v1423_v0 = vpop.f32.mrb[16].mxu0 }
 0x11d   : > { %v1479_v1 = vpop.f32.mrb[16].mxu1  ;;  %v1424_v3 = vpop.f32.mrb[17].mxu0 }
 0x11e   : > { %v710_v4 = vadd.f32 %v1390_v62, %v605_v63  ;;  %v1425_v5 = vadd.f32 %v1424_v3, %v1423_v0  ;;  %v1480_v6 = vpop.f32.mrb[17].mxu1 }
 0x11f   : > { %v1481_v7 = vadd.f32 %v1480_v6, %v1479_v1 }
 0x120   : > { %v780_v8 = vadd.f32 %v1425_v5, %v675_v11  ;;  %v1426_v9 = vpop.f32.mrb[18].mxu0 }
 0x121   : > { %v1482_v10 = vpop.f32.mrb[18].mxu1  ;;  %v1427_v12 = vpop.f32.mrb[19].mxu0 }
 0x122   : > { %v1428_v13 = vadd.f32 %v1427_v12, %v1426_v9  ;;  %v1483_v14 = vpop.f32.mrb[19].mxu1  ;;  %v885_v15 = vadd.f32 %v1481_v7, %v780_v8  ;;  %v1276_v9 = vld [vmem:[%s2518_s5] ss:$0 sm:$0xff] }
 0x123   : > { %v1484_v16 = vadd.f32 %v1483_v14, %v1482_v10 }
 0x124   : > { %v785_v17 = vadd.f32 %v1428_v13, %v680_v19  ;;  %v1429_v18 = vpop.f32.mrb[20].mxu0 }
 0x125   : > { %v1485_v20 = vpop.f32.mrb[20].mxu1  ;;  %v1430_v21 = vpop.f32.mrb[21].mxu0 }
 0x126   : > { %v1431_v2 = vadd.f32 %v1430_v21, %v1429_v18  ;;  %v1486_v22 = vpop.f32.mrb[21].mxu1  ;;  %v890_v23 = vadd.f32 %v1484_v16, %v785_v17 }
 0x127   : > { %v1487_v24 = vadd.f32 %v1486_v22, %v1485_v20 }
 0x128   : > { %v790_v25 = vadd.f32 %v1431_v2, %v685_v27  ;;  %v1432_v26 = vpop.f32.mrb[22].mxu0 }
 0x129   : > { %v1488_v28 = vpop.f32.mrb[22].mxu1  ;;  %v1433_v29 = vpop.f32.mrb[23].mxu0 }
 0x12a   : > { %v1434_v11 = vadd.f32 %v1433_v29, %v1432_v26  ;;  %v1489_v30 = vpop.f32.mrb[23].mxu1  ;;  %v895_v31 = vadd.f32 %v1487_v24, %v790_v25 }
 0x12b   : > { %v1490_v32 = vadd.f32 %v1489_v30, %v1488_v28 }
 0x12c   : > { %v795_v33 = vadd.f32 %v1434_v11, %v690_v35  ;;  %v1435_v34 = vpop.f32.mrb[24].mxu0 }
 0x12d   : > { %v1491_v36 = vpop.f32.mrb[24].mxu1  ;;  %v1436_v37 = vpop.f32.mrb[25].mxu0 }
 0x12e   : > { %v1437_v19 = vadd.f32 %v1436_v37, %v1435_v34  ;;  %v1492_v38 = vpop.f32.mrb[25].mxu1  ;;  %v900_v39 = vadd.f32 %v1490_v32, %v795_v33 }
 0x12f   : > { %v1493_v40 = vadd.f32 %v1492_v38, %v1491_v36 }
 0x130   : > { %v800_v41 = vadd.f32 %v1437_v19, %v695_v43  ;;  %v1438_v42 = vpop.f32.mrb[26].mxu0 }
 0x131   : > { %v1494_v44 = vpop.f32.mrb[26].mxu1  ;;  %v1439_v45 = vpop.f32.mrb[27].mxu0 }
 0x132   : > { %v1440_v27 = vadd.f32 %v1439_v45, %v1438_v42  ;;  %v1495_v46 = vpop.f32.mrb[27].mxu1  ;;  %v905_v47 = vadd.f32 %v1493_v40, %v800_v41 }
 0x133   : > { %v1496_v48 = vadd.f32 %v1495_v46, %v1494_v44 }
 0x134   : > { %v805_v49 = vadd.f32 %v1440_v27, %v700_v51  ;;  %v1441_v50 = vpop.f32.mrb[28].mxu0 }
 0x135   : > { %v1497_v52 = vpop.f32.mrb[28].mxu1  ;;  %v1442_v53 = vpop.f32.mrb[29].mxu0 }
 0x136   : > { %v1443_v35 = vadd.f32 %v1442_v53, %v1441_v50  ;;  %v1498_v54 = vpop.f32.mrb[29].mxu1  ;;  %v910_v55 = vadd.f32 %v1496_v48, %v805_v49 }
 0x137   : > { %v1499_v56 = vadd.f32 %v1498_v54, %v1497_v52 }
 0x138   : > { %v810_v57 = vadd.f32 %v1443_v35, %v705_v59  ;;  %v1444_v58 = vpop.f32.mrb[30].mxu0 }
 0x139   : > { %v1500_v60 = vpop.f32.mrb[30].mxu1  ;;  %v1445_v61 = vpop.f32.mrb[31].mxu0 }
 0x13a   : > { %v1446_v43 = vadd.f32 %v1445_v61, %v1444_v58  ;;  %v1501_v62 = vpop.f32.mrb[31].mxu1  ;;  %v915_v63 = vadd.f32 %v1499_v56, %v810_v57 }
 0x13b   : > { %v1502_v0 = vadd.f32 %v1501_v62, %v1500_v60 }
 0x13c   : > { %v815_v1 = vadd.f32 %v1446_v43, %v710_v4 }
 0x13d   : > { %v1585_v3 = vpop.f32.mrb[32].mxu1 }
 0x13e   : > { %v995_v5 = vadd.f32 %v1585_v3, %v890_v23  ;;  %v989_v51 = vpop.f32.mrb[33].mxu1  ;;  %v1629_v6 = vpop.f32.mrb[32].mxu0  ;;  %v920_v7 = vadd.f32 %v1502_v0, %v815_v1 }
 0x13f   : > { %v990_v8 = vadd.f32 %v989_v51, %v885_v15  ;;  %v1118_v59 = vpop.f32.mrb[33].mxu0 }
 0x140   : > { %v1158_v10 = vadd.f32 %v1629_v6, %v995_v5 }
 0x141   : > { %v1157_v12 = vadd.f32 %v1118_v59, %v990_v8  ;;  %v1588_v13 = vpop.f32.mrb[34].mxu1 }
 0x142   : > { %v1173_v14 = vadd.f32 %v1276_v9, %v1158_v10  ;;  %v1005_v16 = vadd.f32 %v1588_v13, %v900_v39  ;;  %v999_v17 = vpop.f32.mrb[35].mxu1  ;;  %v1632_v18 = vpop.f32.mrb[34].mxu0 }
 0x143   : > { %v1172_v4 = vadd.f32 %v1276_v9, %v1157_v12  ;;  %v1000_v15 = vadd.f32 %v999_v17, %v895_v31  ;;  %v1128_v20 = vpop.f32.mrb[35].mxu0 }
 0x144   : > { %v1181_v21 = vmax.f32 %v1173_v14, 0.0  ;;  %v1160_v2 = vadd.f32 %v1632_v18, %v1005_v16 }
 0x145   : > { %v1180_v22 = vmax.f32 %v1172_v4, 0.0  ;;  %v1159_v23 = vadd.f32 %v1128_v20, %v1000_v15  ;;  %v1591_v24 = vpop.f32.mrb[36].mxu1 }
 0x146   : > { %1189 = vst [vmem:[%s2500_s12 + $0x8] sm:$0xff] %v1181_v21  ;;  %v1175_v25 = vadd.f32 %v1276_v9, %v1160_v2  ;;  %v1015_v26 = vadd.f32 %v1591_v24, %v910_v55  ;;  %v1009_v28 = vpop.f32.mrb[37].mxu1  ;;  %v1635_v29 = vpop.f32.mrb[36].mxu0 }
 0x147   : > { %1188 = vst [vmem:[%s2500_s12] sm:$0xff] %v1180_v22  ;;  %v1174_v11 = vadd.f32 %v1276_v9, %v1159_v23  ;;  %v1010_v30 = vadd.f32 %v1009_v28, %v905_v47  ;;  %v1138_v32 = vpop.f32.mrb[37].mxu0 }
 0x148   : > { %v1183_v33 = vmax.f32 %v1175_v25, 0.0  ;;  %v1162_v34 = vadd.f32 %v1635_v29, %v1015_v26 }
 0x149   : > { %v1182_v31 = vmax.f32 %v1174_v11, 0.0  ;;  %v1161_v36 = vadd.f32 %v1138_v32, %v1010_v30  ;;  %v1594_v37 = vpop.f32.mrb[38].mxu1 }
 0x14a   : > { %1191 = vst [vmem:[%s2500_s12 + $0x18] sm:$0xff] %v1183_v33  ;;  %v1177_v19 = vadd.f32 %v1276_v9, %v1162_v34  ;;  %v1025_v38 = vadd.f32 %v1594_v37, %v920_v7  ;;  %v1019_v39 = vpop.f32.mrb[39].mxu1  ;;  %v1638_v40 = vpop.f32.mrb[38].mxu0 }
 0x14b   : > { %1190 = vst [vmem:[%s2500_s12 + $0x10] sm:$0xff] %v1182_v31  ;;  %v1176_v41 = vadd.f32 %v1276_v9, %v1161_v36  ;;  %v1020_v42 = vadd.f32 %v1019_v39, %v915_v63  ;;  %v1148_v44 = vpop.f32.mrb[39].mxu0 }
 0x14c   : > { %v1185_v45 = vmax.f32 %v1177_v19, 0.0  ;;  %v1164_v27 = vadd.f32 %v1638_v40, %v1025_v38 }
 0x14d   : > { %v1184_v46 = vmax.f32 %v1176_v41, 0.0  ;;  %v1163_v47 = vadd.f32 %v1148_v44, %v1020_v42 }
 0x14e   : > { %1193 = vst [vmem:[%s2500_s12 + $0x28] sm:$0xff] %v1185_v45  ;;  %v1179_v48 = vadd.f32 %v1276_v9, %v1164_v27 }
 0x14f   : > { %1192 = vst [vmem:[%s2500_s12 + $0x20] sm:$0xff] %v1184_v46  ;;  %v1178_v49 = vadd.f32 %v1276_v9, %v1163_v47 }
 0x150   : > { %v1187_v50 = vmax.f32 %v1179_v48, 0.0 }
 0x151   : > { %v1186_v52 = vmax.f32 %v1178_v49, 0.0 }
 0x152   : > { %1195 = vst [vmem:[%s2500_s12 + $0x38] sm:$0xff] %v1187_v50 }
 0x153   : > { %1194 = vst [vmem:[%s2500_s12 + $0x30] sm:$0xff] %v1186_v52 }
 0x154 PF: > { %s16_s21 = sadd.s32 1, %s1862_s21  }
 0x155   : > { %p13_p4 = scmp.ge.s32.totalorder %s16_s21, 4  }
 0x157   :  { %15 = sbr.rel (!%p13_p4) target bundleno = 1 (0x1), region = 77 }

</bundles_post_ra>
